<compile_context>
chip_gen: v7x
topology: tpu7x:2x2x1
jax: 0.10.0
libtpu: 0.0.40
codegen_flags: <defaults>
</compile_context>

<pallas_src>
import jax
import jax.numpy as jnp
from jax.experimental import pallas as pl
from jax.experimental.pallas import tpu as pltpu


_TINY_CIN = 16  # below this, the MXU is K-starved; use an unrolled VPU FMA chain.


def _deconv_rows_kernel(x_ref, w_ref, b_ref, o_ref):
    # x_ref: (th, W, Cin)        block of NHWC input rows
    # w_ref: (2, Cin, 2*Cout)    per-di weight slabs, columns ordered (dj, co)
    # b_ref: (1, 2*Cout)         bias tiled over dj (f32)
    # o_ref: (th, 2, W, 2*Cout)  output row pairs; (W, 2*Cout) == NHWC (2W, Cout)
    th, w, cin = x_ref.shape
    two_cout = o_ref.shape[-1]
    rows = th * w

    xf = x_ref[...].reshape(rows, cin)          # sublane-only merge (W % 8 == 0)
    bias = b_ref[...].astype(jnp.float32)

    for di in range(2):                         # static unroll (kernel size 2)
        wd = w_ref[di]                          # (Cin, 2*Cout)
        if cin <= _TINY_CIN:
            # K too small to feed the MXU usefully -> short VPU broadcast-FMA
            # chain keeps the kernel purely bandwidth limited.
            acc = jnp.zeros((rows, two_cout), jnp.float32)
            for ci in range(cin):               # static unroll (tiny Cin)
                acc = acc + (xf[:, ci:ci + 1].astype(jnp.float32)
                             * wd[ci:ci + 1, :].astype(jnp.float32))
        else:
            acc = jnp.dot(xf, wd, preferred_element_type=jnp.float32)
        acc = acc + bias
        o_ref[:, di, :, :] = acc.reshape(th, w, two_cout).astype(o_ref.dtype)


def _pad_to(v, m):
    return ((v + m - 1) // m) * m


def _block_vmem_bytes(th, w, cin, cout, itemsize):
    in_b = th * _pad_to(w, 8) * _pad_to(cin, 128) * itemsize
    out_b = th * 2 * _pad_to(w, 8) * _pad_to(2 * cout, 128) * itemsize
    return in_b, out_b


def _choose_th(n_rows, w, cin, cout, itemsize, *, rows_target=1024,
               vmem_block_budget=20 << 20):
    """Largest row-block (divisor of n_rows) that amortizes per-step overhead
    while double-buffered in/out blocks fit a conservative VMEM budget
    (safe for v7x's 64 MiB as well as v5e/v6e's 128 MiB)."""
    search_cap = min(n_rows, 4096)
    divisors = [d for d in range(1, search_cap + 1) if n_rows % d == 0] or [1]
    th = 1
    for d in divisors:
        in_b, out_b = _block_vmem_bytes(d, w, cin, cout, itemsize)
        if 2 * (in_b + out_b) > vmem_block_budget:
            break
        th = d
        if d * w >= rows_target:
            break
    # Keep >= 2 grid steps so the pipeline has work to overlap and the single
    # parallel axis can shard across v7x's two TensorCores.
    while th > 1 and n_rows // th < 2:
        smaller = [d for d in divisors if d < th]
        th = smaller[-1] if smaller else 1
    return th


def unetr_deconv_block_nhwc(x_nhwc, weight, bias, *, rows_target=1024):
    """ConvTranspose2d(k=2, s=2, p=0); NHWC in / NHWC out (the hot path).

    x_nhwc: (N, H, W, Cin)
    weight: (Cin, Cout, 2, 2)   -- PyTorch ConvTranspose2d weight layout
    bias:   (Cout,)
    returns (N, 2H, 2W, Cout)
    """
    n, h, w, cin = x_nhwc.shape
    cout = weight.shape[1]
    itemsize = jnp.dtype(x_nhwc.dtype).itemsize

    # Per-di weight slabs: w2[di, ci, dj*Cout + co] = weight[ci, co, di, dj].
    w2 = jnp.transpose(weight, (2, 0, 3, 1)).reshape(2, cin, 2 * cout)
    w2 = w2.astype(x_nhwc.dtype)          # bf16 inputs -> bf16 MXU, f32 accum
    # Bias tiled over dj, kept f32 for the accumulator add.
    b2 = jnp.tile(bias.astype(jnp.float32), (2,)).reshape(1, 2 * cout)

    # Row pool across batch: every output row-pair depends on exactly one input
    # row, so the (N, H) axes merge freely.
    n_rows = n * h
    x_rows = x_nhwc.reshape(n_rows, w, cin)                 # free reshape

    th = _choose_th(n_rows, w, cin, cout, itemsize, rows_target=rows_target)
    grid = (n_rows // th,)

    in_b, out_b = _block_vmem_bytes(th, w, cin, cout, itemsize)
    w_b = 2 * _pad_to(cin, 8) * _pad_to(2 * cout, 128) * itemsize
    b_b = 8 * _pad_to(2 * cout, 128) * 4
    vmem_limit = 2 * (in_b + out_b + w_b + b_b) + (4 << 20)
    vmem_limit = int(min(max(vmem_limit, 32 << 20), 56 << 20))

    out_nbytes = n_rows * 2 * w * 2 * cout * itemsize
    cost = pl.CostEstimate(
        flops=2 * n_rows * w * cin * 4 * cout,
        transcendentals=0,
        bytes_accessed=int(x_nhwc.size * itemsize + w2.size * itemsize
                           + b2.size * 4 + out_nbytes),
    )

    out = pl.pallas_call(
        _deconv_rows_kernel,
        out_shape=jax.ShapeDtypeStruct((n_rows, 2, w, 2 * cout), x_nhwc.dtype),
        grid_spec=pltpu.PrefetchScalarGridSpec(
            num_scalar_prefetch=0,
            grid=grid,
            in_specs=[
                pl.BlockSpec((th, w, cin), lambda r: (r, 0, 0)),
                pl.BlockSpec((2, cin, 2 * cout), lambda r: (0, 0, 0)),
                pl.BlockSpec((1, 2 * cout), lambda r: (0, 0)),
            ],
            out_specs=pl.BlockSpec((th, 2, w, 2 * cout), lambda r: (r, 0, 0, 0)),
        ),
        compiler_params=pltpu.CompilerParams(
            dimension_semantics=("parallel",),
            vmem_limit_bytes=vmem_limit,
        ),
        cost_estimate=cost,
    )(x_rows, w2, b2)

    # (N*H, 2, W, 2*Cout) -> (N, 2H, 2W, Cout): identical flat element order,
    # so this is metadata-only at the XLA level (no HBM pass).
    return out.reshape(n, 2 * h, 2 * w, cout)


def unetr_deconv_block(x_nchw, weight, bias, **kwargs):
    """PyTorch-facing NCHW interface (layout plumbing around the NHWC path).

    In an NHWC end-to-end model, call `unetr_deconv_block_nhwc` directly and
    these two transposes disappear.
    """
    x_nhwc = jnp.transpose(x_nchw, (0, 2, 3, 1))
    y_nhwc = unetr_deconv_block_nhwc(x_nhwc, weight, bias, **kwargs)
    return jnp.transpose(y_nhwc, (0, 3, 1, 2))


def _reference_deconv(x_nchw, weight, bias):
    # Pure-jnp reference of ConvTranspose2d(k=2, s=2, p=0).
    n, cin, h, w = x_nchw.shape
    cout = weight.shape[1]
    y = jnp.einsum("ncij,codk->noidjk", x_nchw, weight)     # (N,Cout,H,2,W,2)
    y = y.reshape(n, cout, 2 * h, 2 * w) + bias[None, :, None, None]
    return y


if __name__ == "__main__":
    key = jax.random.PRNGKey(0)
    k_x, k_w, k_b = jax.random.split(key, 3)

    N, Cin, Cout, H, W = 2, 4, 8, 16, 16

    x = jax.random.normal(k_x, (N, Cin, H, W), dtype=jnp.float32)
    # Deterministic params (shapes match nn.ConvTranspose2d(Cin, Cout, 2, 2)).
    fan = Cin * 2 * 2
    bound = 1.0 / (fan ** 0.5)
    weight = jax.random.uniform(k_w, (Cin, Cout, 2, 2),
                                minval=-bound, maxval=bound, dtype=jnp.float32)
    bias = jax.random.uniform(k_b, (Cout,),
                              minval=-bound, maxval=bound, dtype=jnp.float32)

    # PyTorch-equivalent NCHW interface.
    deconv = jax.jit(unetr_deconv_block)
    out = jax.block_until_ready(deconv(x, weight, bias))

    ref = _reference_deconv(x, weight, bias)
    assert out.shape == (N, Cout, 2 * H, 2 * W), out.shape
    assert jnp.allclose(out, ref, atol=1e-5, rtol=1e-5), "NCHW mismatch vs reference"

    # NHWC hot path (what a fully-NHWC model would call; zero layout passes).
    x_nhwc = jnp.transpose(x, (0, 2, 3, 1))
    out_nhwc = jax.block_until_ready(
        jax.jit(unetr_deconv_block_nhwc)(x_nhwc, weight, bias))
    ref_nhwc = jnp.transpose(ref, (0, 2, 3, 1))
    assert jnp.allclose(out_nhwc, ref_nhwc, atol=1e-5, rtol=1e-5), "NHWC mismatch"

    print("KERNEL_OK")
</pallas_src>

<mosaic_0001>
module attributes {stable_mosaic.version = 11 : i64} {
  func.func @_deconv_rows_kernel(%arg0: i32, %arg1: memref<16x16x4xf32, #tpu.memory_space<vmem>>, %arg2: memref<2x4x16xf32, #tpu.memory_space<vmem>>, %arg3: memref<1x16xf32, #tpu.memory_space<vmem>>, %arg4: memref<16x2x16x16xf32, #tpu.memory_space<vmem>>) attributes {dimension_semantics = [#tpu.dimension_semantics<parallel>], iteration_bounds = array<i64: 2>, scalar_prefetch = 0 : i64, scratch_operands = 0 : i64, tpu.core_type = #tpu.core_type<tc>, window_params = [{transform_indices = @transform_0, window_bounds = array<i64: 16, 16, 4>}, {pipeline_mode = #tpu.pipeline_mode<synchronous>, transform_indices = @transform_1, window_bounds = array<i64: 2, 4, 16>}, {pipeline_mode = #tpu.pipeline_mode<synchronous>, transform_indices = @transform_2, window_bounds = array<i64: 1, 16>}, {transform_indices = @transform_3, window_bounds = array<i64: 16, 2, 16, 16>}]} {
    %c0 = arith.constant 0 : index
    %c0_0 = arith.constant 0 : index
    %c0_1 = arith.constant 0 : index
    %0 = vector.load %arg1[%c0, %c0_0, %c0_1] : memref<16x16x4xf32, #tpu.memory_space<vmem>>, vector<16x16x4xf32>
    %1 = vector.shape_cast %0 : vector<16x16x4xf32> to vector<256x4xf32>
    %c0_2 = arith.constant 0 : index
    %c0_3 = arith.constant 0 : index
    %2 = vector.load %arg3[%c0_2, %c0_3] : memref<1x16xf32, #tpu.memory_space<vmem>>, vector<1x16xf32>
    %c0_4 = arith.constant 0 : index
    %c0_5 = arith.constant 0 : index
    %c0_6 = arith.constant 0 : index
    %3 = vector.load %arg2[%c0_4, %c0_5, %c0_6] : memref<2x4x16xf32, #tpu.memory_space<vmem>>, vector<1x4x16xf32>
    %4 = vector.shape_cast %3 : vector<1x4x16xf32> to vector<4x16xf32>
    %cst = arith.constant 0.000000e+00 : f32
    %5 = vector.broadcast %cst : f32 to vector<256x16xf32>
    %6 = vector.extract_strided_slice %1 {offsets = [0, 0], sizes = [256, 1], strides = [1, 1]} : vector<256x4xf32> to vector<256x1xf32>
    %7 = vector.extract_strided_slice %4 {offsets = [0, 0], sizes = [1, 16], strides = [1, 1]} : vector<4x16xf32> to vector<1x16xf32>
    %8 = vector.broadcast %6 : vector<256x1xf32> to vector<256x16xf32>
    %9 = vector.broadcast %7 : vector<1x16xf32> to vector<256x16xf32>
    %10 = arith.mulf %8, %9 : vector<256x16xf32>
    %11 = arith.addf %5, %10 : vector<256x16xf32>
    %12 = vector.extract_strided_slice %1 {offsets = [0, 1], sizes = [256, 1], strides = [1, 1]} : vector<256x4xf32> to vector<256x1xf32>
    %13 = vector.extract_strided_slice %4 {offsets = [1, 0], sizes = [1, 16], strides = [1, 1]} : vector<4x16xf32> to vector<1x16xf32>
    %14 = vector.broadcast %12 : vector<256x1xf32> to vector<256x16xf32>
    %15 = vector.broadcast %13 : vector<1x16xf32> to vector<256x16xf32>
    %16 = arith.mulf %14, %15 : vector<256x16xf32>
    %17 = arith.addf %11, %16 : vector<256x16xf32>
    %18 = vector.extract_strided_slice %1 {offsets = [0, 2], sizes = [256, 1], strides = [1, 1]} : vector<256x4xf32> to vector<256x1xf32>
    %19 = vector.extract_strided_slice %4 {offsets = [2, 0], sizes = [1, 16], strides = [1, 1]} : vector<4x16xf32> to vector<1x16xf32>
    %20 = vector.broadcast %18 : vector<256x1xf32> to vector<256x16xf32>
    %21 = vector.broadcast %19 : vector<1x16xf32> to vector<256x16xf32>
    %22 = arith.mulf %20, %21 : vector<256x16xf32>
    %23 = arith.addf %17, %22 : vector<256x16xf32>
    %24 = vector.extract_strided_slice %1 {offsets = [0, 3], sizes = [256, 1], strides = [1, 1]} : vector<256x4xf32> to vector<256x1xf32>
    %25 = vector.extract_strided_slice %4 {offsets = [3, 0], sizes = [1, 16], strides = [1, 1]} : vector<4x16xf32> to vector<1x16xf32>
    %26 = vector.broadcast %24 : vector<256x1xf32> to vector<256x16xf32>
    %27 = vector.broadcast %25 : vector<1x16xf32> to vector<256x16xf32>
    %28 = arith.mulf %26, %27 : vector<256x16xf32>
    %29 = arith.addf %23, %28 : vector<256x16xf32>
    %30 = vector.broadcast %2 : vector<1x16xf32> to vector<256x16xf32>
    %31 = arith.addf %29, %30 : vector<256x16xf32>
    %32 = vector.shape_cast %31 : vector<256x16xf32> to vector<16x16x16xf32>
    %c0_7 = arith.constant 0 : index
    %c0_8 = arith.constant 0 : index
    %c0_9 = arith.constant 0 : index
    %c0_10 = arith.constant 0 : index
    %33 = vector.load %arg4[%c0_7, %c0_8, %c0_9, %c0_10] : memref<16x2x16x16xf32, #tpu.memory_space<vmem>>, vector<16x1x16x16xf32>
    %34 = vector.shape_cast %33 : vector<16x1x16x16xf32> to vector<16x16x16xf32>
    %35 = vector.shape_cast %32 : vector<16x16x16xf32> to vector<16x1x16x16xf32>
    tpu.vector_store %arg4[%c0_7, %c0_8, %c0_9, %c0_10], %35 {strides = array<i32>} : memref<16x2x16x16xf32, #tpu.memory_space<vmem>>, vector<16x1x16x16xf32>,
    %c1 = arith.constant 1 : index
    %c0_11 = arith.constant 0 : index
    %c0_12 = arith.constant 0 : index
    %36 = vector.load %arg2[%c1, %c0_11, %c0_12] : memref<2x4x16xf32, #tpu.memory_space<vmem>>, vector<1x4x16xf32>
    %37 = vector.shape_cast %36 : vector<1x4x16xf32> to vector<4x16xf32>
    %cst_13 = arith.constant 0.000000e+00 : f32
    %38 = vector.broadcast %cst_13 : f32 to vector<256x16xf32>
    %39 = vector.extract_strided_slice %1 {offsets = [0, 0], sizes = [256, 1], strides = [1, 1]} : vector<256x4xf32> to vector<256x1xf32>
    %40 = vector.extract_strided_slice %37 {offsets = [0, 0], sizes = [1, 16], strides = [1, 1]} : vector<4x16xf32> to vector<1x16xf32>
    %41 = vector.broadcast %39 : vector<256x1xf32> to vector<256x16xf32>
    %42 = vector.broadcast %40 : vector<1x16xf32> to vector<256x16xf32>
    %43 = arith.mulf %41, %42 : vector<256x16xf32>
    %44 = arith.addf %38, %43 : vector<256x16xf32>
    %45 = vector.extract_strided_slice %1 {offsets = [0, 1], sizes = [256, 1], strides = [1, 1]} : vector<256x4xf32> to vector<256x1xf32>
    %46 = vector.extract_strided_slice %37 {offsets = [1, 0], sizes = [1, 16], strides = [1, 1]} : vector<4x16xf32> to vector<1x16xf32>
    %47 = vector.broadcast %45 : vector<256x1xf32> to vector<256x16xf32>
    %48 = vector.broadcast %46 : vector<1x16xf32> to vector<256x16xf32>
    %49 = arith.mulf %47, %48 : vector<256x16xf32>
    %50 = arith.addf %44, %49 : vector<256x16xf32>
    %51 = vector.extract_strided_slice %1 {offsets = [0, 2], sizes = [256, 1], strides = [1, 1]} : vector<256x4xf32> to vector<256x1xf32>
    %52 = vector.extract_strided_slice %37 {offsets = [2, 0], sizes = [1, 16], strides = [1, 1]} : vector<4x16xf32> to vector<1x16xf32>
    %53 = vector.broadcast %51 : vector<256x1xf32> to vector<256x16xf32>
    %54 = vector.broadcast %52 : vector<1x16xf32> to vector<256x16xf32>
    %55 = arith.mulf %53, %54 : vector<256x16xf32>
    %56 = arith.addf %50, %55 : vector<256x16xf32>
    %57 = vector.extract_strided_slice %1 {offsets = [0, 3], sizes = [256, 1], strides = [1, 1]} : vector<256x4xf32> to vector<256x1xf32>
    %58 = vector.extract_strided_slice %37 {offsets = [3, 0], sizes = [1, 16], strides = [1, 1]} : vector<4x16xf32> to vector<1x16xf32>
    %59 = vector.broadcast %57 : vector<256x1xf32> to vector<256x16xf32>
    %60 = vector.broadcast %58 : vector<1x16xf32> to vector<256x16xf32>
    %61 = arith.mulf %59, %60 : vector<256x16xf32>
    %62 = arith.addf %56, %61 : vector<256x16xf32>
    %63 = vector.broadcast %2 : vector<1x16xf32> to vector<256x16xf32>
    %64 = arith.addf %62, %63 : vector<256x16xf32>
    %65 = vector.shape_cast %64 : vector<256x16xf32> to vector<16x16x16xf32>
    %c0_14 = arith.constant 0 : index
    %c1_15 = arith.constant 1 : index
    %c0_16 = arith.constant 0 : index
    %c0_17 = arith.constant 0 : index
    %66 = vector.load %arg4[%c0_14, %c1_15, %c0_16, %c0_17] : memref<16x2x16x16xf32, #tpu.memory_space<vmem>>, vector<16x1x16x16xf32>
    %67 = vector.shape_cast %66 : vector<16x1x16x16xf32> to vector<16x16x16xf32>
    %68 = vector.shape_cast %65 : vector<16x16x16xf32> to vector<16x1x16x16xf32>
    tpu.vector_store %arg4[%c0_14, %c1_15, %c0_16, %c0_17], %68 {strides = array<i32>} : memref<16x2x16x16xf32, #tpu.memory_space<vmem>>, vector<16x1x16x16xf32>,
    return
  }
  func.func @transform_0(%arg0: i32) -> (i32, i32, i32) {
    %c0_i32 = arith.constant 0 : i32
    %c0_i32_0 = arith.constant 0 : i32
    %c0_i32_1 = arith.constant 0 : i32
    return %arg0, %c0_i32, %c0_i32_0 : i32, i32, i32
  }
  func.func @transform_1(%arg0: i32) -> (i32, i32, i32) {
    %c0_i32 = arith.constant 0 : i32
    %c0_i32_0 = arith.constant 0 : i32
    %c0_i32_1 = arith.constant 0 : i32
    %c0_i32_2 = arith.constant 0 : i32
    return %c0_i32, %c0_i32_0, %c0_i32_1 : i32, i32, i32
  }
  func.func @transform_2(%arg0: i32) -> (i32, i32) {
    %c0_i32 = arith.constant 0 : i32
    %c0_i32_0 = arith.constant 0 : i32
    %c0_i32_1 = arith.constant 0 : i32
    return %c0_i32, %c0_i32_0 : i32, i32
  }
  func.func @transform_3(%arg0: i32) -> (i32, i32, i32, i32) {
    %c0_i32 = arith.constant 0 : i32
    %c0_i32_0 = arith.constant 0 : i32
    %c0_i32_1 = arith.constant 0 : i32
    %c0_i32_2 = arith.constant 0 : i32
    return %arg0, %c0_i32, %c0_i32_0, %c0_i32_1 : i32, i32, i32, i32
  }
}

</mosaic_0001>

<bundles_post_ra>
// kernel: tile.8
= control target key start
LH: loop header
LB: loop body
LE: loop exit
PB: predicated region body
PF: predicated region fallthrough
CT: control target
= control target key end

     0   :  { %s22_s0 = inlined_call_operand.vmem [shape: f32[8], index: 0, kind: input, shape index: {}]   ;;  %s23_s1 = inlined_call_operand.vmem [shape: f32[2,8], index: 1, kind: output, shape index: {}]  }
   0x1   :  { %v4_v0 = vld [vmem:[%s22_s0] ss:$0 sm:$0xff] }
   0x2   :  { %5 = vst [vmem:[%s23_s1] sm:$0x3] %v4_v0 }

// kernel: tile.9
= control target key start
LH: loop header
LB: loop body
LE: loop exit
PB: predicated region body
PF: predicated region fallthrough
CT: control target
= control target key end

     0   :  { %vm7_vm0 = vcmask 64512   ;;  %vm13_vm1 = vcmask 130112   ;;  %s39_s0 = inlined_call_operand.vmem [shape: f32[2,8], index: 0, kind: input, shape index: {}]   ;;  %s40_s1 = inlined_call_operand.vmem [shape: f32[1,16], index: 1, kind: output, shape index: {}]  }
   0x1   :  { %v4_v0 = vld [vmem:[%s39_s0] sm:$0x3]  ;;  %s22_s0 = smov 8  }
   0x2   :  { %5 = vst [vmem:[#allocation1] sm:$0x3] %v4_v0 }
   0x9   :  { %v10_v1 = vld [vmem:[#allocation1 + $0x1] sm:$0x1]   ;;  %v6_v2 = vld [vmem:[#allocation1] sm:$0x1]  }
   0xa   :  { %11 = vrot.lane.b32.xlu0 %v10_v1, %s22_s0  ;;  %8 = vst.msk [vmem:[#allocation0] sm:$0x1] %vm7_vm0, %v6_v2  }
  0x7c   :  { %v12_v3 = vpop.permute.xlu0 %11  }
  0x7d   :  { %14 = vst.msk [vmem:[#allocation0] sm:$0x1] %vm13_vm1, %v12_v3  }
  0x84   :  { %v18_v4 = vld [vmem:[#allocation0] sm:$0x1] }
  0x85   :  { %20 = vst [vmem:[%s40_s1] sm:$0x1] %v18_v4 }

// kernel: unetr_deconv_block.1
= control target key start
LH: loop header
LB: loop body
LE: loop exit
PB: predicated region body
PF: predicated region fallthrough
CT: control target
= control target key end

     0   :  { %s1598_s12 = smov 0   ;;  %s2956_s0 = inlined_call_operand.vmem [shape: f32[32,16,4], index: 0, kind: input, shape index: {}]   ;;  %s2957_s1 = inlined_call_operand.vmem [shape: f32[2,4,16], index: 1, kind: input, shape index: {}]   ;;  %s2958_s2 = inlined_call_operand.vmem [shape: f32[1,16], index: 2, kind: input, shape index: {}]   ;;  %s2959_s3 = inlined_call_operand.vmem [shape: f32[32,2,16,16], index: 3, kind: output, shape index: {}]  }
   0x1 LB: > { %s1497_s13 = sadd.s32 4294967295, %s1572_s12   ;;  %p1501_p0 = scmp.ge.s32.totalorder %s1572_s12, 1  ;;  %s1572_s12 = sphi %s1598_s12, %s13_s12  }
   0x2   : > { %p139_p1 = scmp.lt.s32.totalorder %s1572_s12, 3 }
   0x4   : > { %p140_p2 = pnand %p1501_p0, %p139_p1 }
   0x6   : > { %143 = sbr.rel (%p140_p2) target bundleno = 415 (0x19f), region = 32 }
   0xd   : > { %s1502_s14 = sshll.u32 %s1497_s13, 4  ;;  %v1574_v0 = vmov 0   ;;  %v1575_v33 = vmov 1   ;;  %v1576_v36 = vmov 2   ;;  %v373_v57 = vlaneseq }
   0xe   : > { %1559 = vset.pattern.permute.xlu1 %v1574_v0  ;;  %1558 = vset.pattern.permute.xlu0 %v1574_v0  ;;  %p166_p3 = scmp.lt.s32.totalorder %s1502_s14, 31  ;;  %v1858_v0 = vld [vmem:[%s2957_s1] sm:$0xf]  ;;  %vm1067_vm0 = vcmask 130048  }
   0xf   : > { %v1844_v60 = vshrl.u32 %v373_v57, 7 }
  0x10   : > { %s3134_s14 = smov (!%p166_p3, %s1502_s14), 31 }
  0x11   : > { %s1544_s15 = sshll.u32 %s3134_s14, 4  ;;  %v375_v63 = vsub.s32 0, %v1844_v60  ;;  %s1545_s23 = sshll.u32 %s3134_s14, 5 }
  0x12   : > { %s1612_s18 = scalar_lea.vmem %s2956_s0, %s1544_s15  ;;  %s2557_s28 = scalar_lea.vmem %s2959_s3, %s1545_s23 }
  0x13   : > { %v1615_v1 = vld [vmem:[%s1612_s18 + $0x10] sm:$0xff]  ;;  %v1618_v2 = vld [vmem:[%s1612_s18] sm:$0xff]  ;;  %v1623_v3 = vld [vmem:[%s1612_s18 + $0x18] sm:$0xff] }
  0x14   : > { %225 = vperm.xlu1 %1559, %v1615_v1   ;;  %215 = vperm.xlu0 %1558, %v1618_v2   ;;  %v1626_v4 = vld [vmem:[%s1612_s18 + $0x8] sm:$0xff]  ;;  %v1634_v6 = vld [vmem:[%s1612_s18 + $0x20] sm:$0xff]  ;;  %v1639_v7 = vld [vmem:[%s1612_s18 + $0x38] sm:$0xff] }
  0x15   : > { %v1631_v5 = vld [vmem:[%s1612_s18 + $0x28] sm:$0xff]  ;;  %v1642_v8 = vld [vmem:[%s1612_s18 + $0x30] sm:$0xff]  ;;  %v1650_v10 = vld [vmem:[%s1612_s18 + $0x40] sm:$0xff] }
  0x16   : > { %v1647_v9 = vld [vmem:[%s1612_s18 + $0x48] sm:$0xff]  ;;  %v1655_v11 = vld [vmem:[%s1612_s18 + $0x58] sm:$0xff]  ;;  %v1658_v12 = vld [vmem:[%s1612_s18 + $0x50] sm:$0xff] }
  0x17   : > { %v1663_v13 = vld [vmem:[%s1612_s18 + $0x68] sm:$0xff]  ;;  %v1666_v14 = vld [vmem:[%s1612_s18 + $0x60] sm:$0xff]  ;;  %v1671_v15 = vld [vmem:[%s1612_s18 + $0x78] sm:$0xff] }
  0x18   : > { %230 = vperm.xlu1 %1559, %v1623_v3   ;;  %220 = vperm.xlu0 %1558, %v1626_v4   ;;  %v1674_v16 = vld [vmem:[%s1612_s18 + $0x70] sm:$0xff]  ;;  %v1679_v17 = vld [vmem:[%s1612_s18 + $0x88] sm:$0xff]  ;;  %v1682_v18 = vld [vmem:[%s1612_s18 + $0x80] sm:$0xff] }
  0x19   : > { %v1687_v19 = vld [vmem:[%s1612_s18 + $0x98] sm:$0xff]  ;;  %v1690_v20 = vld [vmem:[%s1612_s18 + $0x90] sm:$0xff]  ;;  %v1695_v21 = vld [vmem:[%s1612_s18 + $0xa8] sm:$0xff] }
  0x1a   : > { %v1698_v22 = vld [vmem:[%s1612_s18 + $0xa0] sm:$0xff]  ;;  %v1703_v23 = vld [vmem:[%s1612_s18 + $0xb8] sm:$0xff]  ;;  %v1706_v24 = vld [vmem:[%s1612_s18 + $0xb0] sm:$0xff] }
  0x1b   : > { %v1711_v25 = vld [vmem:[%s1612_s18 + $0xc8] sm:$0xff]  ;;  %v1714_v26 = vld [vmem:[%s1612_s18 + $0xc0] sm:$0xff]  ;;  %v1719_v27 = vld [vmem:[%s1612_s18 + $0xd8] sm:$0xff] }
  0x1c   : > { %240 = vperm.xlu1 %1559, %v1631_v5   ;;  %235 = vperm.xlu0 %1558, %v1634_v6   ;;  %v1722_v28 = vld [vmem:[%s1612_s18 + $0xd0] sm:$0xff]  ;;  %v1727_v29 = vld [vmem:[%s1612_s18 + $0xe8] sm:$0xff]  ;;  %v1730_v30 = vld [vmem:[%s1612_s18 + $0xe0] sm:$0xff] }
  0x1d   : > { %v1735_v31 = vld [vmem:[%s1612_s18 + $0xf8] sm:$0xff]  ;;  %v1738_v32 = vld [vmem:[%s1612_s18 + $0xf0] sm:$0xff] }
  0x20   : > { %250 = vperm.xlu1 %1559, %v1639_v7   ;;  %245 = vperm.xlu0 %1558, %v1642_v8  }
  0x24   : > { %260 = vperm.xlu1 %1559, %v1647_v9   ;;  %255 = vperm.xlu0 %1558, %v1650_v10  }
  0x28   : > { %270 = vperm.xlu1 %1559, %v1655_v11   ;;  %265 = vperm.xlu0 %1558, %v1658_v12  }
  0x2c   : > { %280 = vperm.xlu1 %1559, %v1663_v13   ;;  %275 = vperm.xlu0 %1558, %v1666_v14  }
  0x30   : > { %290 = vperm.xlu1 %1559, %v1671_v15   ;;  %285 = vperm.xlu0 %1558, %v1674_v16  }
  0x34   : > { %300 = vperm.xlu1 %1559, %v1679_v17   ;;  %295 = vperm.xlu0 %1558, %v1682_v18  }
  0x38   : > { %310 = vperm.xlu1 %1559, %v1687_v19   ;;  %305 = vperm.xlu0 %1558, %v1690_v20  }
  0x3c   : > { %320 = vperm.xlu1 %1559, %v1695_v21   ;;  %315 = vperm.xlu0 %1558, %v1698_v22  }
  0x40   : > { %330 = vperm.xlu1 %1559, %v1703_v23   ;;  %325 = vperm.xlu0 %1558, %v1706_v24  }
  0x44   : > { %340 = vperm.xlu1 %1559, %v1711_v25   ;;  %335 = vperm.xlu0 %1558, %v1714_v26  }
  0x48   : > { %350 = vperm.xlu1 %1559, %v1719_v27   ;;  %345 = vperm.xlu0 %1558, %v1722_v28  }
  0x4c   : > { %360 = vperm.xlu1 %1559, %v1727_v29   ;;  %355 = vperm.xlu0 %1558, %v1730_v30  }
  0x50   : > { %370 = vperm.xlu1 %1559, %v1735_v31   ;;  %365 = vperm.xlu0 %1558, %v1738_v32  }
  0x54   : > { %1561 = vset.pattern.permute.xlu1 %v1575_v33  ;;  %1560 = vset.pattern.permute.xlu0 %v1575_v33  ;;  %v1863_v33 = vld [vmem:[%s2957_s1 + $0x4] sm:$0xf] }
  0x55   : > { %446 = vperm.xlu1 %1561, %v1626_v4   ;;  %442 = vperm.xlu0 %1560, %v1618_v2  }
  0x59   : > { %450 = vperm.xlu1 %1561, %v1615_v1   ;;  %454 = vperm.xlu0 %1560, %v1623_v3  }
  0x5d   : > { %458 = vperm.xlu1 %1561, %v1634_v6   ;;  %462 = vperm.xlu0 %1560, %v1631_v5  }
  0x61   : > { %466 = vperm.xlu1 %1561, %v1642_v8   ;;  %470 = vperm.xlu0 %1560, %v1639_v7  }
  0x65   : > { %474 = vperm.xlu1 %1561, %v1650_v10   ;;  %478 = vperm.xlu0 %1560, %v1647_v9  }
  0x69   : > { %482 = vperm.xlu1 %1561, %v1658_v12   ;;  %486 = vperm.xlu0 %1560, %v1655_v11  }
  0x6d   : > { %490 = vperm.xlu1 %1561, %v1666_v14   ;;  %494 = vperm.xlu0 %1560, %v1663_v13  }
  0x71   : > { %498 = vperm.xlu1 %1561, %v1674_v16   ;;  %502 = vperm.xlu0 %1560, %v1671_v15  }
  0x75   : > { %506 = vperm.xlu1 %1561, %v1682_v18   ;;  %510 = vperm.xlu0 %1560, %v1679_v17  }
  0x79   : > { %514 = vperm.xlu1 %1561, %v1690_v20   ;;  %518 = vperm.xlu0 %1560, %v1687_v19  }
  0x7d   : > { %522 = vperm.xlu1 %1561, %v1698_v22   ;;  %526 = vperm.xlu0 %1560, %v1695_v21  }
  0x81   : > { %530 = vperm.xlu1 %1561, %v1706_v24   ;;  %534 = vperm.xlu0 %1560, %v1703_v23  }
  0x85   : > { %538 = vperm.xlu1 %1561, %v1714_v26   ;;  %542 = vperm.xlu0 %1560, %v1711_v25  }
  0x89   : > { %546 = vperm.xlu1 %1561, %v1722_v28   ;;  %550 = vperm.xlu0 %1560, %v1719_v27  }
  0x8d   : > { %554 = vperm.xlu1 %1561, %v1730_v30   ;;  %558 = vperm.xlu0 %1560, %v1727_v29  }
  0x91   : > { %562 = vperm.xlu1 %1561, %v1738_v32   ;;  %566 = vperm.xlu0 %1560, %v1735_v31  }
  0x93   : > { %v1774_v34 = vpop.permute.xlu1 %225  ;;  %v1776_v35 = vpop.permute.xlu0 %215 }
  0x95   : > { %1562 = vset.pattern.permute.xlu1 %v1576_v36  ;;  %1563 = vset.pattern.permute.xlu0 %v1576_v36 }
  0x96   : > { %638 = vperm.xlu1 %1562, %v1618_v2   ;;  %642 = vperm.xlu0 %1563, %v1626_v4  }
  0x97   : > { %v1780_v37 = vpop.permute.xlu1 %230  ;;  %v1782_v38 = vpop.permute.xlu0 %220 }
  0x9a   : > { %646 = vperm.xlu1 %1562, %v1615_v1   ;;  %654 = vperm.xlu0 %1563, %v1634_v6  }
  0x9b   : > { %v1786_v39 = vpop.permute.xlu1 %240  ;;  %v1788_v40 = vpop.permute.xlu0 %235 }
  0x9e   : > { %650 = vperm.xlu1 %1562, %v1623_v3   ;;  %662 = vperm.xlu0 %1563, %v1642_v8  }
  0x9f   : > { %v1792_v41 = vpop.permute.xlu1 %250  ;;  %v1794_v42 = vpop.permute.xlu0 %245 }
  0xa2   : > { %658 = vperm.xlu1 %1562, %v1631_v5   ;;  %670 = vperm.xlu0 %1563, %v1650_v10  }
  0xa3   : > { %v1798_v43 = vpop.permute.xlu1 %260  ;;  %v1800_v44 = vpop.permute.xlu0 %255 }
  0xa6   : > { %666 = vperm.xlu1 %1562, %v1639_v7   ;;  %678 = vperm.xlu0 %1563, %v1658_v12  }
  0xa7   : > { %v1804_v45 = vpop.permute.xlu1 %270  ;;  %v1806_v46 = vpop.permute.xlu0 %265 }
  0xaa   : > { %674 = vperm.xlu1 %1562, %v1647_v9   ;;  %686 = vperm.xlu0 %1563, %v1666_v14  }
  0xab   : > { %v1810_v47 = vpop.permute.xlu1 %280  ;;  %v1812_v48 = vpop.permute.xlu0 %275 }
  0xae   : > { %682 = vperm.xlu1 %1562, %v1655_v11   ;;  %694 = vperm.xlu0 %1563, %v1674_v16  }
  0xaf   : > { %v1816_v49 = vpop.permute.xlu1 %290  ;;  %v1818_v50 = vpop.permute.xlu0 %285 }
  0xb2   : > { %690 = vperm.xlu1 %1562, %v1663_v13   ;;  %702 = vperm.xlu0 %1563, %v1682_v18  }
  0xb3   : > { %v1822_v51 = vpop.permute.xlu1 %300  ;;  %v1824_v52 = vpop.permute.xlu0 %295 }
  0xb4   : > { %2993 = vst [vmem:[#allocation2_spill] sm:$0xff] %v1822_v51 }
  0xb6   : > { %698 = vperm.xlu1 %1562, %v1671_v15   ;;  %710 = vperm.xlu0 %1563, %v1690_v20  }
  0xb7   : > { %v1828_v53 = vpop.permute.xlu1 %310  ;;  %v1830_v54 = vpop.permute.xlu0 %305 }
  0xb8   : > { %2994 = vst [vmem:[#allocation3_spill] sm:$0xff] %v1828_v53  ;;  %2995 = vst [vmem:[#allocation4_spill] sm:$0xff] %v1830_v54 }
  0xba   : > { %706 = vperm.xlu1 %1562, %v1679_v17   ;;  %718 = vperm.xlu0 %1563, %v1698_v22  }
  0xbb   : > { %v1834_v55 = vpop.permute.xlu1 %320  ;;  %v1836_v56 = vpop.permute.xlu0 %315 }
  0xbc   : > { %2996 = vst [vmem:[#allocation5_spill] sm:$0xff] %v1834_v55  ;;  %2997 = vst [vmem:[#allocation6_spill] sm:$0xff] %v1836_v56 }
  0xbe   : > { %714 = vperm.xlu1 %1562, %v1687_v19   ;;  %726 = vperm.xlu0 %1563, %v1706_v24  }
  0xbf   : > { %v1840_v58 = vpop.permute.xlu1 %330  ;;  %v1842_v59 = vpop.permute.xlu0 %325 }
  0xc0   : > { %2998 = vst [vmem:[#allocation7_spill] sm:$0xff] %v1840_v58  ;;  %2999 = vst [vmem:[#allocation8_spill] sm:$0xff] %v1842_v59 }
  0xc2   : > { %722 = vperm.xlu1 %1562, %v1695_v21   ;;  %734 = vperm.xlu0 %1563, %v1714_v26  }
  0xc3   : > { %v1848_v61 = vpop.permute.xlu1 %340  ;;  %v1850_v62 = vpop.permute.xlu0 %335 }
  0xc4   : > { %3000 = vst [vmem:[#allocation9_spill] sm:$0xff] %v1848_v61  ;;  %3001 = vst [vmem:[#allocation10_spill] sm:$0xff] %v1850_v62  ;;  %v1870_v62 = vrot.slane %v1858_v0, %v375_v63  ;;  %v1873_v61 = vrot.slane %v1863_v33, %v375_v63 }
  0xc6   : > { %730 = vperm.xlu1 %1562, %v1703_v23   ;;  %742 = vperm.xlu0 %1563, %v1722_v28  }
  0xc7   : > { %v1865_v36 = vpop.permute.xlu1 %350  ;;  %v1867_v57 = vpop.permute.xlu0 %345 }
  0xc8   : > { %3002 = vst [vmem:[#allocation11_spill] sm:$0xff] %v1865_v36  ;;  %3003 = vst [vmem:[#allocation12_spill] sm:$0xff] %v1867_v57 }
  0xca   : > { %738 = vperm.xlu1 %1562, %v1711_v25   ;;  %750 = vperm.xlu0 %1563, %v1730_v30  }
  0xcb   : > { %v1877_v59 = vpop.permute.xlu1 %360  ;;  %v356_v58 = vpop.permute.xlu0 %355 }
  0xcc   : > { %3004 = vst [vmem:[#allocation13_spill] sm:$0xff] %v1877_v59  ;;  %v1880_v56 = vmul.f32 %v1870_v62, %v356_v58  ;;  %v1883_v36 = vmul.f32 %v1873_v61, %v356_v58  ;;  %v1577_v59 = vmov 3  }
  0xce   : > { %746 = vperm.xlu1 %1562, %v1719_v27   ;;  %758 = vperm.xlu0 %1563, %v1738_v32  }
  0xcf   : > { %v1887_v57 = vpop.permute.xlu1 %370  ;;  %v366_v63 = vpop.permute.xlu0 %365 }
  0xd0   : > { %3005 = vst [vmem:[#allocation14_spill] sm:$0xff] %v1887_v57  ;;  %v1890_v55 = vmul.f32 %v1870_v62, %v366_v63  ;;  %v1893_v54 = vmul.f32 %v1873_v61, %v366_v63 }
  0xd2   : > { %754 = vperm.xlu1 %1562, %v1727_v29   ;;  %1564 = vset.pattern.permute.xlu0 %v1577_v59 }
  0xd3   : > { %834 = vperm.xlu0 %1564, %v1618_v2  }
  0xd4   : > { %v1897_v58 = vpop.permute.xlu1 %446  ;;  %v1899_v53 = vpop.permute.xlu0 %442 }
  0xd5   : > { %3006 = vst [vmem:[#allocation15_spill] sm:$0xff] %v1899_v53 }
  0xd6   : > { %762 = vperm.xlu1 %1562, %v1735_v31  }
  0xd7   : > { %846 = vperm.xlu0 %1564, %v1623_v3  }
  0xd8   : > { %v1903_v57 = vpop.permute.xlu1 %450  ;;  %v1905_v51 = vpop.permute.xlu0 %454 }
  0xda   : > { %1565 = vset.pattern.permute.xlu1 %v1577_v59 }
  0xdb   : > { %838 = vperm.xlu1 %1565, %v1626_v4   ;;  %854 = vperm.xlu0 %1564, %v1631_v5  }
  0xdc   : > { %v1909_v63 = vpop.permute.xlu1 %458  ;;  %v1911_v2 = vpop.permute.xlu0 %462 }
  0xdf   : > { %842 = vperm.xlu1 %1565, %v1615_v1   ;;  %862 = vperm.xlu0 %1564, %v1639_v7  }
  0xe0   : > { %v1915_v53 = vpop.permute.xlu1 %466  ;;  %v1917_v3 = vpop.permute.xlu0 %470 }
  0xe3   : > { %850 = vperm.xlu1 %1565, %v1634_v6   ;;  %870 = vperm.xlu0 %1564, %v1647_v9  }
  0xe4   : > { %v1921_v59 = vpop.permute.xlu1 %474  ;;  %v1923_v4 = vpop.permute.xlu0 %478 }
  0xe7   : > { %858 = vperm.xlu1 %1565, %v1642_v8   ;;  %878 = vperm.xlu0 %1564, %v1655_v11  }
  0xe8   : > { %v1927_v5 = vpop.permute.xlu1 %482  ;;  %v1929_v1 = vpop.permute.xlu0 %486 }
  0xeb   : > { %866 = vperm.xlu1 %1565, %v1650_v10   ;;  %886 = vperm.xlu0 %1564, %v1663_v13  }
  0xec   : > { %v1933_v7 = vpop.permute.xlu1 %490  ;;  %v1935_v6 = vpop.permute.xlu0 %494 }
  0xef   : > { %874 = vperm.xlu1 %1565, %v1658_v12   ;;  %894 = vperm.xlu0 %1564, %v1671_v15  }
  0xf0   : > { %v1939_v9 = vpop.permute.xlu1 %498  ;;  %v1941_v8 = vpop.permute.xlu0 %502 }
  0xf1   : > { %3007 = vst [vmem:[#allocation16_spill] sm:$0xff] %v1941_v8 }
  0xf3   : > { %882 = vperm.xlu1 %1565, %v1666_v14   ;;  %902 = vperm.xlu0 %1564, %v1679_v17  }
  0xf4   : > { %v1945_v11 = vpop.permute.xlu1 %506  ;;  %v1947_v10 = vpop.permute.xlu0 %510 }
  0xf5   : > { %3008 = vst [vmem:[#allocation17_spill] sm:$0xff] %v1947_v10 }
  0xf7   : > { %890 = vperm.xlu1 %1565, %v1674_v16   ;;  %910 = vperm.xlu0 %1564, %v1687_v19  }
  0xf8   : > { %v1951_v13 = vpop.permute.xlu1 %514  ;;  %v1953_v12 = vpop.permute.xlu0 %518 }
  0xf9   : > { %3009 = vst [vmem:[#allocation18_spill] sm:$0xff] %v1953_v12 }
  0xfb   : > { %898 = vperm.xlu1 %1565, %v1682_v18   ;;  %918 = vperm.xlu0 %1564, %v1695_v21   ;;  %v571_v21 = vsub.s32 1, %v1844_v60 }
  0xfc   : > { %v1957_v15 = vpop.permute.xlu1 %522  ;;  %v1959_v14 = vpop.permute.xlu0 %526 }
  0xfd   : > { %3010 = vst [vmem:[#allocation19_spill] sm:$0xff] %v1959_v14  ;;  %v767_v14 = vsub.s32 2, %v1844_v60 }
  0xff   : > { %906 = vperm.xlu1 %1565, %v1690_v20   ;;  %926 = vperm.xlu0 %1564, %v1703_v23  }
 0x100   : > { %v1963_v17 = vpop.permute.xlu1 %530  ;;  %v1965_v16 = vpop.permute.xlu0 %534 }
 0x101   : > { %3011 = vst [vmem:[#allocation20_spill] sm:$0xff] %v1965_v16  ;;  %v1981_v16 = vrot.slane %v1858_v0, %v571_v21 }
 0x103   : > { %914 = vperm.xlu1 %1565, %v1698_v22   ;;  %934 = vperm.xlu0 %1564, %v1711_v25   ;;  %v1984_v22 = vrot.slane %v1863_v33, %v571_v21 }
 0x104   : > { %v1969_v19 = vpop.permute.xlu1 %538  ;;  %v1971_v18 = vpop.permute.xlu0 %542 }
 0x105   : > { %3012 = vst [vmem:[#allocation21_spill] sm:$0xff] %v1971_v18 }
 0x107   : > { %922 = vperm.xlu1 %1565, %v1706_v24   ;;  %942 = vperm.xlu0 %1564, %v1719_v27  }
 0x108   : > { %v1976_v20 = vpop.permute.xlu1 %546  ;;  %v1978_v23 = vpop.permute.xlu0 %550 }
 0x109   : > { %3013 = vst [vmem:[#allocation22_spill] sm:$0xff] %v1978_v23 }
 0x10b   : > { %930 = vperm.xlu1 %1565, %v1714_v26   ;;  %950 = vperm.xlu0 %1564, %v1727_v29  }
 0x10c   : > { %v555_v25 = vpop.permute.xlu1 %554  ;;  %v1988_v18 = vpop.permute.xlu0 %558 }
 0x10d   : > { %3014 = vst [vmem:[#allocation23_spill] sm:$0xff] %v1988_v18  ;;  %v601_v24 = vmul.f32 %v1981_v16, %v555_v25  ;;  %v1202_v27 = vmul.f32 %v1984_v22, %v555_v25  ;;  %v574_v25 = vmul.f32 %v1981_v16, %v1897_v58 }
 0x10f   : > { %v1994_v23 = vadd.f32 %v601_v24, %v1880_v56  ;;  %v1997_v12 = vadd.f32 %v1202_v27, %v1883_v36  ;;  %938 = vperm.xlu1 %1565, %v1722_v28   ;;  %958 = vperm.xlu0 %1564, %v1735_v31   ;;  %v1175_v56 = vmul.f32 %v1984_v22, %v1897_v58 }
 0x110   : > { %v563_v26 = vpop.permute.xlu1 %562  ;;  %v2001_v29 = vpop.permute.xlu0 %566  ;;  %v2010_v36 = vrot.slane %v1858_v0, %v767_v14  ;;  %v2013_v28 = vrot.slane %v1863_v33, %v767_v14  ;;  %v378_v27 = vmul.f32 %v1870_v62, %v1782_v38  ;;  %v1107_v58 = vmul.f32 %v1873_v61, %v1782_v38 }
 0x111   : > { %3015 = vst [vmem:[#allocation24_spill] sm:$0xff] %v1994_v23  ;;  %3016 = vst [vmem:[#allocation25_spill] sm:$0xff] %v1997_v12  ;;  %v603_v21 = vmul.f32 %v1981_v16, %v563_v26  ;;  %v1204_v18 = vmul.f32 %v1984_v22, %v563_v26  ;;  %v575_v26 = vmul.f32 %v1981_v16, %v1903_v57 }
 0x112   : > { %3017 = vst [vmem:[#allocation26_spill] sm:$0xff] %v2001_v29  ;;  %v1176_v14 = vmul.f32 %v1984_v22, %v1903_v57  ;;  %v606_v29 = vadd.f32 %v574_v25, %v378_v27  ;;  %v381_v12 = vmul.f32 %v1870_v62, %v1788_v40  ;;  %v579_v27 = vmul.f32 %v1981_v16, %v1915_v53 }
 0x113   : > { %v2016_v31 = vadd.f32 %v603_v21, %v1890_v55  ;;  %v2019_v24 = vadd.f32 %v1204_v18, %v1893_v54  ;;  %946 = vperm.xlu1 %1565, %v1730_v30   ;;  %v379_v55 = vmul.f32 %v1870_v62, %v1774_v34  ;;  %v1108_v54 = vmul.f32 %v1873_v61, %v1774_v34 }
 0x114   : > { %v577_v30 = vmul.f32 %v1981_v16, %v1909_v63  ;;  %v1178_v18 = vmul.f32 %v1984_v22, %v1909_v63  ;;  %v1110_v34 = vmul.f32 %v1873_v61, %v1788_v40 }
 0x115   : > { %3018 = vst [vmem:[#allocation27_spill] sm:$0xff] %v2016_v31  ;;  %3019 = vst [vmem:[#allocation28_spill] sm:$0xff] %v2019_v24  ;;  %v2038_v21 = vpop.permute.xlu1 %638  ;;  %v643_v38 = vpop.permute.xlu0 %642  ;;  %v1207_v24 = vadd.f32 %v1175_v56, %v1107_v58  ;;  %v607_v23 = vadd.f32 %v575_v26, %v379_v55  ;;  %v1208_v10 = vadd.f32 %v1176_v14, %v1108_v54 }
 0x116   : > { %3020 = vst [vmem:[#allocation29_spill] sm:$0xff] %v2038_v21  ;;  %v770_v31 = vmul.f32 %v2010_v36, %v643_v38  ;;  %v1243_v57 = vmul.f32 %v2013_v28, %v643_v38  ;;  %v609_v25 = vadd.f32 %v577_v30, %v381_v12  ;;  %v1210_v56 = vadd.f32 %v1178_v18, %v1110_v34 }
 0x117   : > { %954 = vperm.xlu1 %1565, %v1738_v32   ;;  %v1180_v58 = vmul.f32 %v1984_v22, %v1915_v53  ;;  %v383_v12 = vmul.f32 %v1870_v62, %v1794_v42  ;;  %v581_v54 = vmul.f32 %v1981_v16, %v1921_v59 }
 0x118   : > { %v2047_v63 = vadd.f32 %v770_v31, %v606_v29  ;;  %v2049_v21 = vadd.f32 %v1243_v57, %v1207_v24  ;;  %v1112_v31 = vmul.f32 %v1873_v61, %v1794_v42 }
 0x119   : > { %v647_v38 = vpop.permute.xlu1 %646  ;;  %v655_v8 = vpop.permute.xlu0 %654  ;;  %v611_v57 = vadd.f32 %v579_v27, %v383_v12 }
 0x11a   : > { %3021 = vst [vmem:[#allocation30_spill] sm:$0xff] %v2047_v63  ;;  %3022 = vst [vmem:[#allocation31_spill] sm:$0xff] %v2049_v21  ;;  %v771_v40 = vmul.f32 %v2010_v36, %v647_v38  ;;  %v1244_v32 = vmul.f32 %v2013_v28, %v647_v38  ;;  %v773_v26 = vmul.f32 %v2010_v36, %v655_v8 }
 0x11b   : > { %v1246_v29 = vmul.f32 %v2013_v28, %v655_v8  ;;  %v1182_v8 = vmul.f32 %v1984_v22, %v1921_v59  ;;  %v1212_v34 = vadd.f32 %v1180_v58, %v1112_v31  ;;  %v583_v58 = vmul.f32 %v1981_v16, %v1927_v5 }
 0x11c   : > { %v2063_v24 = vadd.f32 %v771_v40, %v607_v23  ;;  %v2065_v14 = vadd.f32 %v1244_v32, %v1208_v10  ;;  %v2067_v53 = vadd.f32 %v773_v26, %v609_v25  ;;  %v385_v23 = vmul.f32 %v1870_v62, %v1800_v44 }
 0x11d   : > { %v2069_v55 = vadd.f32 %v1246_v29, %v1210_v56  ;;  %v2075_v30 = vpop.permute.xlu1 %650  ;;  %v663_v18 = vpop.permute.xlu0 %662  ;;  %v1114_v25 = vmul.f32 %v1873_v61, %v1800_v44  ;;  %v1184_v26 = vmul.f32 %v1984_v22, %v1927_v5  ;;  %v387_v44 = vmul.f32 %v1870_v62, %v1806_v46 }
 0x11e   : > { %3023 = vst [vmem:[#allocation32_spill] sm:$0xff] %v2063_v24  ;;  %3024 = vst [vmem:[#allocation33_spill] sm:$0xff] %v2065_v14  ;;  %v775_v42 = vmul.f32 %v2010_v36, %v663_v18  ;;  %v1248_v10 = vmul.f32 %v2013_v28, %v663_v18  ;;  %v613_v59 = vadd.f32 %v581_v54, %v385_v23  ;;  %v3050_v14 = vld [vmem:[#allocation7_spill] sm:$0xff] }
 0x11f   : > { %3025 = vst [vmem:[#allocation34_spill] sm:$0xff] %v2067_v53  ;;  %3026 = vst [vmem:[#allocation35_spill] sm:$0xff] %v2069_v55  ;;  %v1214_v40 = vadd.f32 %v1182_v8, %v1114_v25  ;;  %v1116_v31 = vmul.f32 %v1873_v61, %v1806_v46  ;;  %v2105_v18 = vmul.f32 %v1870_v62, %v1776_v35 }
 0x120   : > { %3027 = vst [vmem:[#allocation36_spill] sm:$0xff] %v2075_v30  ;;  %v2083_v56 = vadd.f32 %v775_v42, %v611_v57  ;;  %v2085_v38 = vadd.f32 %v1248_v10, %v1212_v34  ;;  %v585_v5 = vmul.f32 %v1981_v16, %v1933_v7  ;;  %v1186_v57 = vmul.f32 %v1984_v22, %v1933_v7 }
 0x121   : > { %v2087_v32 = vpop.permute.xlu1 %658  ;;  %v671_v27 = vpop.permute.xlu0 %670  ;;  %v615_v10 = vadd.f32 %v583_v58, %v387_v44  ;;  %v1216_v23 = vadd.f32 %v1184_v26, %v1116_v31  ;;  %v389_v7 = vmul.f32 %v1870_v62, %v1812_v48  ;;  %v2129_v58 = vmul.f32 %v1873_v61, %v1780_v37 }
 0x122   : > { %3028 = vst [vmem:[#allocation37_spill] sm:$0xff] %v2083_v56  ;;  %3029 = vst [vmem:[#allocation38_spill] sm:$0xff] %v2085_v38  ;;  %v777_v29 = vmul.f32 %v2010_v36, %v671_v27  ;;  %v1250_v12 = vmul.f32 %v2013_v28, %v671_v27  ;;  %v1118_v27 = vmul.f32 %v1873_v61, %v1812_v48  ;;  %v3043_v38 = vld [vmem:[#allocation3_spill] sm:$0xff] }
 0x123   : > { %3030 = vst [vmem:[#allocation39_spill] sm:$0xff] %v2087_v32  ;;  %v2133_v26 = vmul.f32 %v1870_v62, %v1786_v39  ;;  %v2145_v44 = vmul.f32 %v1870_v62, %v1792_v41  ;;  %v617_v48 = vadd.f32 %v585_v5, %v389_v7  ;;  %v2161_v5 = vmul.f32 %v1870_v62, %v1798_v43 }
 0x124   : > { %v2099_v54 = vadd.f32 %v777_v29, %v613_v59  ;;  %v2101_v8 = vadd.f32 %v1250_v12, %v1214_v40  ;;  %v2117_v59 = vmul.f32 %v1873_v61, %v1776_v35  ;;  %v2121_v40 = vmul.f32 %v1870_v62, %v1780_v37 }
 0x125   : > { %v2111_v34 = vpop.permute.xlu1 %666  ;;  %v679_v42 = vpop.permute.xlu0 %678  ;;  %v2141_v12 = vmul.f32 %v1873_v61, %v1786_v39  ;;  %v1218_v31 = vadd.f32 %v1186_v57, %v1118_v27  ;;  %v2165_v57 = vmul.f32 %v1873_v61, %v1798_v43  ;;  %v1120_v7 = vmul.f32 %v1873_v61, %v1818_v50 }
 0x126   : > { %3031 = vst [vmem:[#allocation40_spill] sm:$0xff] %v2099_v54  ;;  %3032 = vst [vmem:[#allocation41_spill] sm:$0xff] %v2101_v8  ;;  %v779_v46 = vmul.f32 %v2010_v36, %v679_v42  ;;  %v1252_v25 = vmul.f32 %v2013_v28, %v679_v42  ;;  %v587_v8 = vmul.f32 %v1981_v16, %v1939_v9 }
 0x127   : > { %3033 = vst [vmem:[#allocation42_spill] sm:$0xff] %v2111_v34  ;;  %v2185_v43 = vmul.f32 %v1870_v62, %v1810_v47  ;;  %v2225_v56 = vmul.f32 %v1870_v62, %v3043_v38  ;;  %v593_v24 = vmul.f32 %v1981_v16, %v1957_v15  ;;  %v3059_v34 = vld [vmem:[#allocation11_spill] sm:$0xff] }
 0x128   : > { %v2135_v35 = vadd.f32 %v779_v46, %v615_v10  ;;  %v2137_v29 = vadd.f32 %v1252_v25, %v1216_v23  ;;  %v1188_v10 = vmul.f32 %v1984_v22, %v1939_v9  ;;  %v2157_v46 = vmul.f32 %v1873_v61, %v1792_v41 }
 0x129   : > { %v2147_v37 = vpop.permute.xlu1 %674  ;;  %v687_v42 = vpop.permute.xlu0 %686  ;;  %v2169_v25 = vmul.f32 %v1870_v62, %v1804_v45  ;;  %v391_v9 = vmul.f32 %v1870_v62, %v1818_v50 }
 0x12a   : > { %3034 = vst [vmem:[#allocation43_spill] sm:$0xff] %v2135_v35  ;;  %3035 = vst [vmem:[#allocation44_spill] sm:$0xff] %v2137_v29  ;;  %v781_v23 = vmul.f32 %v2010_v36, %v687_v42  ;;  %v1254_v39 = vmul.f32 %v2013_v28, %v687_v42  ;;  %v2181_v42 = vmul.f32 %v1873_v61, %v1804_v45 }
 0x12b   : > { %3036 = vst [vmem:[#allocation45_spill] sm:$0xff] %v2147_v37  ;;  %v589_v29 = vmul.f32 %v1981_v16, %v1945_v11  ;;  %v1190_v35 = vmul.f32 %v1984_v22, %v1945_v11  ;;  %v393_v11 = vmul.f32 %v1870_v62, %v1824_v52 }
 0x12c   : > { %v2175_v41 = vadd.f32 %v781_v23, %v617_v48  ;;  %v2177_v27 = vadd.f32 %v1254_v39, %v1218_v31  ;;  %v619_v48 = vadd.f32 %v587_v8, %v391_v9  ;;  %v1220_v31 = vadd.f32 %v1188_v10, %v1120_v7  ;;  %v3040_v10 = vld [vmem:[#allocation2_spill] sm:$0xff] }
 0x12d   : > { %v2191_v54 = vpop.permute.xlu1 %682  ;;  %v695_v50 = vpop.permute.xlu0 %694  ;;  %v2197_v39 = vmul.f32 %v1873_v61, %v1810_v47  ;;  %v2209_v8 = vmul.f32 %v1873_v61, %v1816_v49  ;;  %v2213_v9 = vmul.f32 %v1870_v62, %v3040_v10 }
 0x12e   : > { %3037 = vst [vmem:[#allocation46_spill] sm:$0xff] %v2175_v41  ;;  %3038 = vst [vmem:[#allocation47_spill] sm:$0xff] %v2177_v27  ;;  %v783_v23 = vmul.f32 %v2010_v36, %v695_v50  ;;  %v1256_v45 = vmul.f32 %v2013_v28, %v695_v50  ;;  %v2201_v27 = vmul.f32 %v1870_v62, %v1816_v49 }
 0x12f   : > { %3039 = vst [vmem:[#allocation48_spill] sm:$0xff] %v2191_v54  ;;  %v1122_v41 = vmul.f32 %v1873_v61, %v1824_v52  ;;  %v2221_v50 = vmul.f32 %v1873_v61, %v3040_v10  ;;  %v621_v52 = vadd.f32 %v589_v29, %v393_v11  ;;  %v591_v54 = vmul.f32 %v1981_v16, %v1951_v13  ;;  %v3045_v10 = vld [vmem:[#allocation4_spill] sm:$0xff] }
 0x130   : > { %v2215_v47 = vadd.f32 %v783_v23, %v619_v48  ;;  %v2217_v7 = vadd.f32 %v1256_v45, %v1220_v31  ;;  %v1192_v48 = vmul.f32 %v1984_v22, %v1951_v13  ;;  %v2237_v45 = vmul.f32 %v1873_v61, %v3043_v38 }
 0x131   : > { %v1222_v55 = vadd.f32 %v1190_v35, %v1122_v41  ;;  %v2227_v49 = vpop.permute.xlu1 %690  ;;  %v703_v53 = vpop.permute.xlu0 %702  ;;  %v395_v35 = vmul.f32 %v1870_v62, %v3045_v10  ;;  %v1124_v29 = vmul.f32 %v1873_v61, %v3045_v10  ;;  %v3046_v41 = vld [vmem:[#allocation5_spill] sm:$0xff]  ;;  %v2261_v10 = vmul.f32 %v1870_v62, %v3050_v14 }
 0x132   : > { %3041 = vst [vmem:[#allocation2_spill] sm:$0xff] %v2215_v47  ;;  %3042 = vst [vmem:[#allocation49_spill] sm:$0xff] %v2217_v7  ;;  %v785_v31 = vmul.f32 %v2010_v36, %v703_v53  ;;  %v1258_v23 = vmul.f32 %v2013_v28, %v703_v53  ;;  %v2245_v11 = vmul.f32 %v1870_v62, %v3046_v41  ;;  %v3047_v7 = vld [vmem:[#allocation6_spill] sm:$0xff] }
 0x133   : > { %3044 = vst [vmem:[#allocation3_spill] sm:$0xff] %v2227_v49  ;;  %v2249_v13 = vmul.f32 %v1873_v61, %v3046_v41  ;;  %v397_v53 = vmul.f32 %v1870_v62, %v3047_v7  ;;  %v1126_v49 = vmul.f32 %v1873_v61, %v3047_v7  ;;  %v1194_v41 = vmul.f32 %v1984_v22, %v1957_v15  ;;  %v3053_v15 = vld [vmem:[#allocation9_spill] sm:$0xff] }
 0x134   : > { %v2253_v47 = vadd.f32 %v785_v31, %v621_v52  ;;  %v2255_v38 = vadd.f32 %v1258_v23, %v1222_v55  ;;  %v623_v52 = vadd.f32 %v591_v54, %v395_v35  ;;  %v1224_v31 = vadd.f32 %v1192_v48, %v1124_v29  ;;  %v3056_v48 = vld [vmem:[#allocation10_spill] sm:$0xff] }
 0x135   : > { %v2267_v21 = vpop.permute.xlu1 %698  ;;  %v711_v63 = vpop.permute.xlu0 %710  ;;  %v2273_v7 = vmul.f32 %v1873_v61, %v3050_v14  ;;  %v2285_v54 = vmul.f32 %v1873_v61, %v3053_v15  ;;  %v1130_v29 = vmul.f32 %v1873_v61, %v3056_v48  ;;  %v625_v32 = vadd.f32 %v593_v24, %v397_v53  ;;  %v3063_v53 = vld [vmem:[#allocation13_spill] sm:$0xff] }
 0x136   : > { %3048 = vst [vmem:[#allocation4_spill] sm:$0xff] %v2253_v47  ;;  %3049 = vst [vmem:[#allocation5_spill] sm:$0xff] %v2255_v38  ;;  %v787_v55 = vmul.f32 %v2010_v36, %v711_v63  ;;  %v1260_v23 = vmul.f32 %v2013_v28, %v711_v63  ;;  %v3052_v38 = vld [vmem:[#allocation8_spill] sm:$0xff]  ;;  %v401_v63 = vmul.f32 %v1870_v62, %v3056_v48 }
 0x137   : > { %3051 = vst [vmem:[#allocation6_spill] sm:$0xff] %v2267_v21  ;;  %v399_v47 = vmul.f32 %v1870_v62, %v3052_v38  ;;  %v1128_v37 = vmul.f32 %v1873_v61, %v3052_v38  ;;  %v2281_v21 = vmul.f32 %v1870_v62, %v3053_v15  ;;  %3055 = vst [vmem:[#allocation8_spill] sm:$0xff] %v2285_v54  ;;  %v3062_v48 = vld [vmem:[#allocation12_spill] sm:$0xff] }
 0x138   : > { %v2289_v35 = vadd.f32 %v787_v55, %v623_v52  ;;  %v2291_v14 = vadd.f32 %v1260_v23, %v1224_v31  ;;  %v2297_v38 = vmul.f32 %v1870_v62, %v3059_v34  ;;  %v595_v54 = vmul.f32 %v1981_v16, %v1963_v17 }
 0x139   : > { %3054 = vst [vmem:[#allocation7_spill] sm:$0xff] %v2281_v21  ;;  %v1226_v21 = vadd.f32 %v1194_v41, %v1126_v49  ;;  %v2299_v30 = vpop.permute.xlu1 %706  ;;  %v719_v15 = vpop.permute.xlu0 %718  ;;  %v1196_v52 = vmul.f32 %v1984_v22, %v1963_v17  ;;  %v2309_v23 = vmul.f32 %v1873_v61, %v3059_v34  ;;  %v403_v24 = vmul.f32 %v1870_v62, %v3062_v48 }
 0x13a   : > { %3057 = vst [vmem:[#allocation9_spill] sm:$0xff] %v2289_v35  ;;  %3058 = vst [vmem:[#allocation10_spill] sm:$0xff] %v2291_v14  ;;  %v789_v31 = vmul.f32 %v2010_v36, %v719_v15  ;;  %v1262_v55 = vmul.f32 %v2013_v28, %v719_v15  ;;  %v1132_v49 = vmul.f32 %v1873_v61, %v3062_v48  ;;  %v963_v34 = vsub.s32 3, %v1844_v60  ;;  %v3067_v35 = vld [vmem:[#allocation15_spill] sm:$0xff] }
 0x13b   : > { %3060 = vst [vmem:[#allocation11_spill] sm:$0xff] %v2299_v30  ;;  %3061 = vst [vmem:[#allocation50_spill] sm:$0xff] %v2309_v23  ;;  %v2317_v41 = vmul.f32 %v1870_v62, %v3063_v53  ;;  %v2321_v17 = vmul.f32 %v1873_v61, %v3063_v53  ;;  %v573_v30 = vmul.f32 %v1981_v16, %v3067_v35 }
 0x13c   : > { %v2323_v14 = vadd.f32 %v789_v31, %v625_v32  ;;  %v2325_v15 = vadd.f32 %v1262_v55, %v1226_v21  ;;  %v1174_v48 = vmul.f32 %v1984_v22, %v3067_v35  ;;  %v597_v23 = vmul.f32 %v1981_v16, %v1969_v19 }
 0x13d   : > { %3064 = vst [vmem:[#allocation12_spill] sm:$0xff] %v2317_v41  ;;  %v1198_v41 = vmul.f32 %v1984_v22, %v1969_v19  ;;  %v2336_v53 = vpop.permute.xlu1 %714  ;;  %v727_v32 = vpop.permute.xlu0 %726  ;;  %v627_v31 = vadd.f32 %v595_v54, %v399_v47  ;;  %v1228_v21 = vadd.f32 %v1196_v52, %v1128_v37  ;;  %v576_v19 = vmul.f32 %v1981_v16, %v1905_v51 }
 0x13e   : > { %3065 = vst [vmem:[#allocation13_spill] sm:$0xff] %v2323_v14  ;;  %3066 = vst [vmem:[#allocation51_spill] sm:$0xff] %v2325_v15  ;;  %v791_v55 = vmul.f32 %v2010_v36, %v727_v32  ;;  %v1264_v60 = vmul.f32 %v2013_v28, %v727_v32  ;;  %v3069_v15 = vld [vmem:[#allocation14_spill] sm:$0xff]  ;;  %v2357_v54 = vrot.slane %v1858_v0, %v963_v34 }
 0x13f   : > { %3068 = vst [vmem:[#allocation15_spill] sm:$0xff] %v2336_v53  ;;  %v2342_v14 = vmul.f32 %v1870_v62, %v3069_v15  ;;  %v2346_v35 = vmul.f32 %v1873_v61, %v3069_v15  ;;  %v1177_v53 = vmul.f32 %v1984_v22, %v1905_v51  ;;  %v2360_v62 = vrot.slane %v1863_v33, %v963_v34 }
 0x140   : > { %v2352_v47 = vadd.f32 %v791_v55, %v627_v31  ;;  %v2354_v37 = vadd.f32 %v1264_v60, %v1228_v21  ;;  %v2363_v52 = vadd.f32 %v573_v30, %v2105_v18  ;;  %v2366_v61 = vadd.f32 %v1174_v48, %v2117_v59 }
 0x141   : > { %3070 = vst [vmem:[#allocation14_spill] sm:$0xff] %v2346_v35  ;;  %v629_v15 = vadd.f32 %v597_v23, %v401_v63  ;;  %v1230_v32 = vadd.f32 %v1198_v41, %v1130_v29  ;;  %v2368_v35 = vpop.permute.xlu1 %722  ;;  %v735_v51 = vpop.permute.xlu0 %734  ;;  %v599_v31 = vmul.f32 %v1981_v16, %v1976_v20  ;;  %v1200_v0 = vmul.f32 %v1984_v22, %v1976_v20 }
 0x142   : > { %v793_v33 = vmul.f32 %v2010_v36, %v735_v51  ;;  %v1266_v34 = vmul.f32 %v2013_v28, %v735_v51  ;;  %v2377_v30 = vadd.f32 %v576_v19, %v2121_v40  ;;  %v2380_v18 = vadd.f32 %v1177_v53, %v2129_v58  ;;  %v3071_v51 = vld [vmem:[#allocation16_spill] sm:$0xff] }
 0x143   : > { %v578_v59 = vmul.f32 %v1981_v16, %v1911_v2  ;;  %v1179_v63 = vmul.f32 %v1984_v22, %v1911_v2  ;;  %v580_v29 = vmul.f32 %v1981_v16, %v1917_v3  ;;  %v1181_v20 = vmul.f32 %v1984_v22, %v1917_v3 }
 0x144   : > { %v2390_v23 = vadd.f32 %v793_v33, %v629_v15  ;;  %v2392_v41 = vadd.f32 %v1266_v34, %v1230_v32  ;;  %v582_v40 = vmul.f32 %v1981_v16, %v1923_v4  ;;  %v1183_v58 = vmul.f32 %v1984_v22, %v1923_v4 }
 0x145   : > { %v584_v48 = vmul.f32 %v1981_v16, %v1929_v1  ;;  %v1185_v2 = vmul.f32 %v1984_v22, %v1929_v1  ;;  %v2402_v53 = vpop.permute.xlu1 %730  ;;  %v743_v21 = vpop.permute.xlu0 %742  ;;  %v631_v3 = vadd.f32 %v599_v31, %v403_v24  ;;  %v1232_v55 = vadd.f32 %v1200_v0, %v1132_v49 }
 0x146   : > { %v795_v60 = vmul.f32 %v2010_v36, %v743_v21  ;;  %v1268_v19 = vmul.f32 %v2013_v28, %v743_v21  ;;  %v2407_v15 = vadd.f32 %v578_v59, %v2133_v26  ;;  %v2410_v4 = vadd.f32 %v1179_v63, %v2141_v12 }
 0x147   : > { %v586_v32 = vmul.f32 %v1981_v16, %v1935_v6  ;;  %v1187_v1 = vmul.f32 %v1984_v22, %v1935_v6  ;;  %v588_v24 = vmul.f32 %v1981_v16, %v3071_v51  ;;  %v1189_v49 = vmul.f32 %v1984_v22, %v3071_v51 }
 0x148   : > { %v2420_v31 = vadd.f32 %v795_v60, %v631_v3  ;;  %v2422_v0 = vadd.f32 %v1268_v19, %v1232_v55  ;;  %v2425_v26 = vadd.f32 %v580_v29, %v2145_v44  ;;  %v2428_v12 = vadd.f32 %v1181_v20, %v2157_v46  ;;  %v3080_v60 = vld [vmem:[#allocation19_spill] sm:$0xff] }
 0x149   : > { %v2431_v33 = vadd.f32 %v582_v40, %v2161_v5  ;;  %v2434_v6 = vadd.f32 %v1183_v58, %v2165_v57  ;;  %v2436_v34 = vpop.permute.xlu1 %738  ;;  %v751_v59 = vpop.permute.xlu0 %750  ;;  %v2439_v63 = vadd.f32 %v584_v48, %v2169_v25  ;;  %v2442_v21 = vadd.f32 %v1185_v2, %v2181_v42  ;;  %v3074_v57 = vld [vmem:[#allocation17_spill] sm:$0xff]  ;;  %v3075_v58 = vld [vmem:[#allocation24_spill] sm:$0xff] }
 0x14a   : > { %3072 = vst [vmem:[#allocation16_spill] sm:$0xff] %v2420_v31  ;;  %3073 = vst [vmem:[#allocation52_spill] sm:$0xff] %v2422_v0  ;;  %v797_v44 = vmul.f32 %v2010_v36, %v751_v59  ;;  %v1270_v46 = vmul.f32 %v2013_v28, %v751_v59  ;;  %v2447_v29 = vadd.f32 %v586_v32, %v2185_v43  ;;  %v3077_v43 = vld [vmem:[#allocation25_spill] sm:$0xff] }
 0x14b   : > { %v2450_v5 = vadd.f32 %v1187_v1, %v2197_v39  ;;  %v590_v20 = vmul.f32 %v1981_v16, %v3074_v57  ;;  %v1191_v25 = vmul.f32 %v1984_v22, %v3074_v57  ;;  %v2457_v40 = vadd.f32 %v588_v24, %v2201_v27  ;;  %v3079_v39 = vld [vmem:[#allocation18_spill] sm:$0xff]  ;;  %v3081_v1 = vld [vmem:[#allocation20_spill] sm:$0xff]  ;;  %v3082_v57 = vld [vmem:[#allocation29_spill] sm:$0xff] }
 0x14c   : > { %v2460_v42 = vadd.f32 %v1189_v49, %v2209_v8  ;;  %v2463_v48 = vadd.f32 %v797_v44, %v3075_v58  ;;  %v2466_v2 = vadd.f32 %v1270_v46, %v3077_v43  ;;  %v592_v3 = vmul.f32 %v1981_v16, %v3079_v39 }
 0x14d   : > { %v1193_v55 = vmul.f32 %v1984_v22, %v3079_v39  ;;  %v594_v19 = vmul.f32 %v1981_v16, %v3080_v60  ;;  %v1195_v27 = vmul.f32 %v1984_v22, %v3080_v60  ;;  %v2476_v8 = vpop.permute.xlu1 %746  ;;  %v759_v32 = vpop.permute.xlu0 %758  ;;  %v596_v51 = vmul.f32 %v1981_v16, %v3081_v1  ;;  %v3083_v39 = vld [vmem:[#allocation21_spill] sm:$0xff] }
 0x14e   : > { %3076 = vst [vmem:[#allocation17_spill] sm:$0xff] %v2463_v48  ;;  %3078 = vst [vmem:[#allocation24_spill] sm:$0xff] %v2466_v2  ;;  %v1197_v24 = vmul.f32 %v1984_v22, %v3081_v1  ;;  %v799_v49 = vmul.f32 %v2010_v36, %v759_v32  ;;  %v1272_v59 = vmul.f32 %v2013_v28, %v759_v32  ;;  %v3084_v1 = vld [vmem:[#allocation27_spill] sm:$0xff] }
 0x14f   : > { %v2485_v44 = vadd.f32 %v590_v20, %v2213_v9  ;;  %v2488_v46 = vadd.f32 %v1191_v25, %v2221_v50  ;;  %v769_v58 = vmul.f32 %v2010_v36, %v3082_v57  ;;  %v1242_v43 = vmul.f32 %v2013_v28, %v3082_v57  ;;  %v3086_v9 = vld [vmem:[#allocation28_spill] sm:$0xff] }
 0x150   : > { %v598_v60 = vmul.f32 %v1981_v16, %v3083_v39  ;;  %v1199_v32 = vmul.f32 %v1984_v22, %v3083_v39  ;;  %v2499_v2 = vadd.f32 %v799_v49, %v3084_v1  ;;  %v2502_v20 = vadd.f32 %v1272_v59, %v3086_v9  ;;  %v3088_v39 = vld [vmem:[#allocation36_spill] sm:$0xff] }
 0x151   : > { %v2505_v50 = vadd.f32 %v592_v3, %v2225_v56  ;;  %v2508_v25 = vadd.f32 %v1193_v55, %v2237_v45  ;;  %v2511_v57 = vadd.f32 %v594_v19, %v2245_v11  ;;  %v2514_v48 = vadd.f32 %v1195_v27, %v2249_v13  ;;  %v2516_v0 = vpop.permute.xlu1 %754  ;;  %v3089_v19 = vld [vmem:[#allocation7_spill] sm:$0xff] }
 0x152   : > { %3085 = vst [vmem:[#allocation25_spill] sm:$0xff] %v2499_v2  ;;  %3087 = vst [vmem:[#allocation18_spill] sm:$0xff] %v2502_v20  ;;  %v2519_v49 = vadd.f32 %v596_v51, %v2261_v10  ;;  %v2522_v59 = vadd.f32 %v1197_v24, %v2273_v7  ;;  %v772_v56 = vmul.f32 %v2010_v36, %v3088_v39  ;;  %v835_v3 = vpop.permute.xlu0 %834  ;;  %v3090_v7 = vld [vmem:[#allocation8_spill] sm:$0xff]  ;;  %v3091_v24 = vld [vmem:[#allocation22_spill] sm:$0xff] }
 0x153   : > { %v1245_v45 = vmul.f32 %v2013_v28, %v3088_v39  ;;  %v801_v11 = vadd.f32 %v769_v58, %v2363_v52  ;;  %v1274_v13 = vadd.f32 %v1242_v43, %v2366_v61  ;;  %v965_v55 = vmul.f32 %v2357_v54, %v835_v3  ;;  %v2546_v52 = vld [vmem:[%s2958_s2] ss:$0 sm:$0xff]  ;;  %v3092_v61 = vld [vmem:[#allocation23_spill] sm:$0xff] }
 0x154   : > { %v1310_v10 = vmul.f32 %v2360_v62, %v835_v3  ;;  %v2534_v27 = vadd.f32 %v598_v60, %v3089_v19  ;;  %v2537_v51 = vadd.f32 %v1199_v32, %v3090_v7  ;;  %v600_v1 = vmul.f32 %v1981_v16, %v3091_v24  ;;  %v3093_v3 = vld [vmem:[#allocation26_spill] sm:$0xff] }
 0x155   : > { %v1201_v9 = vmul.f32 %v1984_v22, %v3091_v24  ;;  %v602_v58 = vmul.f32 %v1981_v16, %v3092_v61  ;;  %v1203_v43 = vmul.f32 %v1984_v22, %v3092_v61  ;;  %v997_v60 = vadd.f32 %v965_v55, %v801_v11  ;;  %v2552_v39 = vpop.permute.xlu1 %762 }
 0x156   : > { %v1342_v32 = vadd.f32 %v1310_v10, %v1274_v13  ;;  %v604_v19 = vmul.f32 %v1981_v16, %v3093_v3  ;;  %v1205_v7 = vmul.f32 %v1984_v22, %v3093_v3  ;;  %v804_v24 = vadd.f32 %v772_v56, %v2377_v30  ;;  %v847_v13 = vpop.permute.xlu0 %846  ;;  %v3094_v16 = vld [vmem:[#allocation50_spill] sm:$0xff]  ;;  %v3095_v22 = vld [vmem:[#allocation39_spill] sm:$0xff]  ;;  %v3096_v56 = vld [vmem:[#allocation12_spill] sm:$0xff] }
 0x157   : > { %v1277_v11 = vadd.f32 %v1245_v45, %v2380_v18  ;;  %v1035_v55 = vadd.f32 %v2546_v52, %v997_v60  ;;  %v968_v61 = vmul.f32 %v2357_v54, %v847_v13  ;;  %v1313_v20 = vmul.f32 %v2360_v62, %v847_v13  ;;  %v3098_v13 = vld [vmem:[#allocation42_spill] sm:$0xff] }
 0x158   : > { %v1374_v10 = vadd.f32 %v2546_v52, %v1342_v32  ;;  %v2570_v2 = vadd.f32 %v600_v1, %v2297_v38  ;;  %v2573_v31 = vadd.f32 %v1201_v9, %v3094_v16  ;;  %v774_v30 = vmul.f32 %v2010_v36, %v3095_v22  ;;  %v3097_v32 = vld [vmem:[#allocation14_spill] sm:$0xff]  ;;  %v3099_v16 = vld [vmem:[#allocation45_spill] sm:$0xff] }
 0x159   : > { %v1247_v18 = vmul.f32 %v2013_v28, %v3095_v22  ;;  %v2580_v45 = vadd.f32 %v602_v58, %v3096_v56  ;;  %v2583_v60 = vadd.f32 %v1203_v43, %v2321_v17  ;;  %1068 = vst.msk [vmem:[%s2557_s28] sm:$0xff] %vm1067_vm0, %v1035_v55  ;;  %v1000_v38 = vadd.f32 %v968_v61, %v804_v24 }
 0x15a   : > { %1510 = vst.msk [vmem:[%s2557_s28 + $0x10] sm:$0xff] %vm1067_vm0, %v1374_v10  ;;  %v1345_v1 = vadd.f32 %v1313_v20, %v1277_v11  ;;  %v2590_v9 = vadd.f32 %v604_v19, %v2342_v14  ;;  %v2593_v3 = vadd.f32 %v1205_v7, %v3097_v32  ;;  %v776_v58 = vmul.f32 %v2010_v36, %v3098_v13  ;;  %v839_v43 = vpop.permute.xlu1 %838  ;;  %v855_v19 = vpop.permute.xlu0 %854  ;;  %v3101_v32 = vld [vmem:[#allocation31_spill] sm:$0xff] }
 0x15b   : > { %v1249_v17 = vmul.f32 %v2013_v28, %v3098_v13  ;;  %v1038_v55 = vadd.f32 %v2546_v52, %v1000_v38  ;;  %v966_v20 = vmul.f32 %v2357_v54, %v839_v43  ;;  %v1311_v14 = vmul.f32 %v2360_v62, %v839_v43  ;;  %v3100_v38 = vld [vmem:[#allocation30_spill] sm:$0xff] }
 0x15c   : > { %v1377_v24 = vadd.f32 %v2546_v52, %v1345_v1  ;;  %v806_v7 = vadd.f32 %v774_v30, %v2407_v15  ;;  %v1279_v11 = vadd.f32 %v1247_v18, %v2410_v4  ;;  %v970_v10 = vmul.f32 %v2357_v54, %v855_v19 }
 0x15d   : > { %v1315_v61 = vmul.f32 %v2360_v62, %v855_v19  ;;  %v778_v22 = vmul.f32 %v2010_v36, %v3099_v16  ;;  %v1251_v56 = vmul.f32 %v2013_v28, %v3099_v16  ;;  %1071 = vst.msk [vmem:[%s2557_s28 + $0x28] sm:$0xff] %vm1067_vm0, %v1038_v55  ;;  %v998_v1 = vadd.f32 %v966_v20, %v3100_v38 }
 0x15e   : > { %1513 = vst.msk [vmem:[%s2557_s28 + $0x38] sm:$0xff] %vm1067_vm0, %v1377_v24  ;;  %v1343_v15 = vadd.f32 %v1311_v14, %v3101_v32  ;;  %v808_v4 = vadd.f32 %v776_v58, %v2425_v26  ;;  %v1281_v30 = vadd.f32 %v1249_v17, %v2428_v12  ;;  %v1002_v18 = vadd.f32 %v970_v10, %v806_v7  ;;  %v843_v43 = vpop.permute.xlu1 %842  ;;  %v863_v20 = vpop.permute.xlu0 %862 }
 0x15f   : > { %v1347_v13 = vadd.f32 %v1315_v61, %v1279_v11  ;;  %v1036_v19 = vadd.f32 %v2546_v52, %v998_v1  ;;  %v967_v55 = vmul.f32 %v2357_v54, %v843_v43  ;;  %v1312_v24 = vmul.f32 %v2360_v62, %v843_v43  ;;  %v3102_v11 = vld [vmem:[#allocation32_spill] sm:$0xff]  ;;  %v3103_v61 = vld [vmem:[#allocation33_spill] sm:$0xff] }
 0x160   : > { %v1375_v16 = vadd.f32 %v2546_v52, %v1343_v15  ;;  %v1040_v26 = vadd.f32 %v2546_v52, %v1002_v18  ;;  %v972_v12 = vmul.f32 %v2357_v54, %v863_v20  ;;  %v1317_v17 = vmul.f32 %v2360_v62, %v863_v20  ;;  %v3104_v1 = vld [vmem:[#allocation48_spill] sm:$0xff] }
 0x161   : > { %v1379_v58 = vadd.f32 %v2546_v52, %v1347_v13  ;;  %v810_v14 = vadd.f32 %v778_v22, %v2431_v33  ;;  %v1283_v7 = vadd.f32 %v1251_v56, %v2434_v6  ;;  %1069 = vst.msk [vmem:[%s2557_s28 + $0x8] sm:$0xff] %vm1067_vm0, %v1036_v19  ;;  %v999_v10 = vadd.f32 %v967_v55, %v3102_v11 }
 0x162   : > { %1511 = vst.msk [vmem:[%s2557_s28 + $0x18] sm:$0xff] %vm1067_vm0, %v1375_v16  ;;  %v1344_v38 = vadd.f32 %v1312_v24, %v3103_v61  ;;  %v780_v32 = vmul.f32 %v2010_v36, %v3104_v1  ;;  %v1253_v15 = vmul.f32 %v2013_v28, %v3104_v1  ;;  %1073 = vst.msk [vmem:[%s2557_s28 + $0x48] sm:$0xff] %vm1067_vm0, %v1040_v26  ;;  %v851_v22 = vpop.permute.xlu1 %850  ;;  %v871_v19 = vpop.permute.xlu0 %870 }
 0x163   : > { %1515 = vst.msk [vmem:[%s2557_s28 + $0x58] sm:$0xff] %vm1067_vm0, %v1379_v58  ;;  %v1004_v33 = vadd.f32 %v972_v12, %v808_v4  ;;  %v1349_v6 = vadd.f32 %v1317_v17, %v1281_v30  ;;  %v1037_v56 = vadd.f32 %v2546_v52, %v999_v10  ;;  %v969_v13 = vmul.f32 %v2357_v54, %v851_v22  ;;  %v3105_v30 = vld [vmem:[#allocation3_spill] sm:$0xff]  ;;  %v3106_v58 = vld [vmem:[#allocation34_spill] sm:$0xff] }
 0x164   : > { %v1376_v18 = vadd.f32 %v2546_v52, %v1344_v38  ;;  %v1314_v43 = vmul.f32 %v2360_v62, %v851_v22  ;;  %v974_v24 = vmul.f32 %v2357_v54, %v871_v19  ;;  %v1319_v4 = vmul.f32 %v2360_v62, %v871_v19  ;;  %v3107_v17 = vld [vmem:[#allocation35_spill] sm:$0xff] }
 0x165   : > { %v1042_v16 = vadd.f32 %v2546_v52, %v1004_v33  ;;  %v1381_v55 = vadd.f32 %v2546_v52, %v1349_v6  ;;  %v782_v20 = vmul.f32 %v2010_v36, %v3105_v30  ;;  %v1255_v26 = vmul.f32 %v2013_v28, %v3105_v30  ;;  %1070 = vst.msk [vmem:[%s2557_s28 + $0x20] sm:$0xff] %vm1067_vm0, %v1037_v56 }
 0x166   : > { %1512 = vst.msk [vmem:[%s2557_s28 + $0x30] sm:$0xff] %vm1067_vm0, %v1376_v18  ;;  %v1001_v12 = vadd.f32 %v969_v13, %v3106_v58  ;;  %v1346_v11 = vadd.f32 %v1314_v43, %v3107_v17  ;;  %v812_v10 = vadd.f32 %v780_v32, %v2439_v63  ;;  %v1285_v61 = vadd.f32 %v1253_v15, %v2442_v21  ;;  %v859_v33 = vpop.permute.xlu1 %858  ;;  %v879_v21 = vpop.permute.xlu0 %878  ;;  %v3108_v43 = vld [vmem:[#allocation37_spill] sm:$0xff] }
 0x167   : > { %1075 = vst.msk [vmem:[%s2557_s28 + $0x68] sm:$0xff] %vm1067_vm0, %v1042_v16  ;;  %1517 = vst.msk [vmem:[%s2557_s28 + $0x78] sm:$0xff] %vm1067_vm0, %v1381_v55  ;;  %v1006_v38 = vadd.f32 %v974_v24, %v810_v14  ;;  %v1351_v1 = vadd.f32 %v1319_v4, %v1283_v7  ;;  %v971_v56 = vmul.f32 %v2357_v54, %v859_v33  ;;  %v3109_v16 = vld [vmem:[#allocation38_spill] sm:$0xff] }
 0x168   : > { %v1039_v6 = vadd.f32 %v2546_v52, %v1001_v12  ;;  %v1378_v22 = vadd.f32 %v2546_v52, %v1346_v11  ;;  %v1316_v63 = vmul.f32 %v2360_v62, %v859_v33  ;;  %v976_v18 = vmul.f32 %v2357_v54, %v879_v21  ;;  %v3110_v24 = vld [vmem:[#allocation6_spill] sm:$0xff] }
 0x169   : > { %v1044_v32 = vadd.f32 %v2546_v52, %v1006_v38  ;;  %v1383_v15 = vadd.f32 %v2546_v52, %v1351_v1  ;;  %v1321_v14 = vmul.f32 %v2360_v62, %v879_v21  ;;  %v814_v7 = vadd.f32 %v782_v20, %v2447_v29  ;;  %v3113_v21 = vld [vmem:[#allocation41_spill] sm:$0xff] }
 0x16a   : > { %v1287_v13 = vadd.f32 %v1255_v26, %v2450_v5  ;;  %1072 = vst.msk [vmem:[%s2557_s28 + $0x40] sm:$0xff] %vm1067_vm0, %v1039_v6  ;;  %1514 = vst.msk [vmem:[%s2557_s28 + $0x50] sm:$0xff] %vm1067_vm0, %v1378_v22  ;;  %v1003_v19 = vadd.f32 %v971_v56, %v3108_v43  ;;  %v1348_v55 = vadd.f32 %v1316_v63, %v3109_v16  ;;  %v867_v20 = vpop.permute.xlu1 %866  ;;  %v887_v11 = vpop.permute.xlu0 %886  ;;  %v3112_v56 = vld [vmem:[#allocation40_spill] sm:$0xff] }
 0x16b   : > { %v784_v4 = vmul.f32 %v2010_v36, %v3110_v24  ;;  %v1257_v30 = vmul.f32 %v2013_v28, %v3110_v24  ;;  %1077 = vst.msk [vmem:[%s2557_s28 + $0x88] sm:$0xff] %vm1067_vm0, %v1044_v32  ;;  %1519 = vst.msk [vmem:[%s2557_s28 + $0x98] sm:$0xff] %vm1067_vm0, %v1383_v15  ;;  %v1008_v29 = vadd.f32 %v976_v18, %v812_v10 }
 0x16c   : > { %v1353_v5 = vadd.f32 %v1321_v14, %v1285_v61  ;;  %v1041_v26 = vadd.f32 %v2546_v52, %v1003_v19  ;;  %v1380_v58 = vadd.f32 %v2546_v52, %v1348_v55  ;;  %v973_v12 = vmul.f32 %v2357_v54, %v867_v20  ;;  %v3111_v61 = vld [vmem:[#allocation11_spill] sm:$0xff] }
 0x16d   : > { %v1318_v17 = vmul.f32 %v2360_v62, %v867_v20  ;;  %v1046_v38 = vadd.f32 %v2546_v52, %v1008_v29  ;;  %v978_v33 = vmul.f32 %v2357_v54, %v887_v11  ;;  %v1323_v10 = vmul.f32 %v2360_v62, %v887_v11  ;;  %v3114_v20 = vld [vmem:[#allocation43_spill] sm:$0xff] }
 0x16e   : > { %v1385_v1 = vadd.f32 %v2546_v52, %v1353_v5  ;;  %v786_v6 = vmul.f32 %v2010_v36, %v3111_v61  ;;  %v1259_v22 = vmul.f32 %v2013_v28, %v3111_v61  ;;  %1074 = vst.msk [vmem:[%s2557_s28 + $0x60] sm:$0xff] %vm1067_vm0, %v1041_v26  ;;  %1516 = vst.msk [vmem:[%s2557_s28 + $0x70] sm:$0xff] %vm1067_vm0, %v1380_v58  ;;  %v875_v19 = vpop.permute.xlu1 %874  ;;  %v3115_v58 = vld [vmem:[#allocation44_spill] sm:$0xff] }
 0x16f   : > { %v1005_v63 = vadd.f32 %v973_v12, %v3112_v56  ;;  %v1350_v32 = vadd.f32 %v1318_v17, %v3113_v21  ;;  %v816_v15 = vadd.f32 %v784_v4, %v2457_v40  ;;  %v1289_v18 = vadd.f32 %v1257_v30, %v2460_v42  ;;  %1079 = vst.msk [vmem:[%s2557_s28 + $0xa8] sm:$0xff] %vm1067_vm0, %v1046_v38  ;;  %v895_v42 = vpop.permute.xlu0 %894  ;;  %v3116_v17 = vld [vmem:[#allocation15_spill] sm:$0xff] }
 0x170   : > { %1521 = vst.msk [vmem:[%s2557_s28 + $0xb8] sm:$0xff] %vm1067_vm0, %v1385_v1  ;;  %v1010_v14 = vadd.f32 %v978_v33, %v814_v7  ;;  %v1355_v43 = vadd.f32 %v1323_v10, %v1287_v13  ;;  %v975_v24 = vmul.f32 %v2357_v54, %v875_v19  ;;  %v1320_v40 = vmul.f32 %v2360_v62, %v875_v19  ;;  %v3118_v19 = vld [vmem:[#allocation47_spill] sm:$0xff] }
 0x171   : > { %v1043_v16 = vadd.f32 %v2546_v52, %v1005_v63  ;;  %v1382_v55 = vadd.f32 %v2546_v52, %v1350_v32  ;;  %v980_v29 = vmul.f32 %v2357_v54, %v895_v42  ;;  %v1325_v7 = vmul.f32 %v2360_v62, %v895_v42 }
 0x172   : > { %v1048_v4 = vadd.f32 %v2546_v52, %v1010_v14  ;;  %v1387_v30 = vadd.f32 %v2546_v52, %v1355_v43  ;;  %v818_v13 = vadd.f32 %v786_v6, %v2485_v44  ;;  %v1291_v5 = vadd.f32 %v1259_v22, %v2488_v46  ;;  %v883_v1 = vpop.permute.xlu1 %882  ;;  %v3117_v14 = vld [vmem:[#allocation46_spill] sm:$0xff] }
 0x173   : > { %1076 = vst.msk [vmem:[%s2557_s28 + $0x80] sm:$0xff] %vm1067_vm0, %v1043_v16  ;;  %1518 = vst.msk [vmem:[%s2557_s28 + $0x90] sm:$0xff] %vm1067_vm0, %v1382_v55  ;;  %v1007_v26 = vadd.f32 %v975_v24, %v3114_v20  ;;  %v1352_v12 = vadd.f32 %v1320_v40, %v3115_v58  ;;  %v788_v11 = vmul.f32 %v2010_v36, %v3116_v17  ;;  %v903_v22 = vpop.permute.xlu0 %902 }
 0x174   : > { %v1261_v38 = vmul.f32 %v2013_v28, %v3116_v17  ;;  %1081 = vst.msk [vmem:[%s2557_s28 + $0xc8] sm:$0xff] %vm1067_vm0, %v1048_v4  ;;  %1523 = vst.msk [vmem:[%s2557_s28 + $0xd8] sm:$0xff] %vm1067_vm0, %v1387_v30  ;;  %v1012_v44 = vadd.f32 %v980_v29, %v816_v15  ;;  %v1357_v46 = vadd.f32 %v1325_v7, %v1289_v18 }
 0x175   : > { %v1045_v33 = vadd.f32 %v2546_v52, %v1007_v26  ;;  %v1384_v10 = vadd.f32 %v2546_v52, %v1352_v12  ;;  %v977_v61 = vmul.f32 %v2357_v54, %v883_v1  ;;  %v1322_v6 = vmul.f32 %v2360_v62, %v883_v1  ;;  %v3119_v12 = vld [vmem:[#allocation2_spill] sm:$0xff] }
 0x176   : > { %v1050_v56 = vadd.f32 %v2546_v52, %v1012_v44  ;;  %v1389_v63 = vadd.f32 %v2546_v52, %v1357_v46  ;;  %v982_v21 = vmul.f32 %v2357_v54, %v903_v22  ;;  %v1327_v32 = vmul.f32 %v2360_v62, %v903_v22  ;;  %v891_v42 = vpop.permute.xlu1 %890 }
 0x177   : > { %v790_v15 = vmul.f32 %v2010_v36, %v2368_v35  ;;  %v1263_v18 = vmul.f32 %v2013_v28, %v2368_v35  ;;  %1078 = vst.msk [vmem:[%s2557_s28 + $0xa0] sm:$0xff] %vm1067_vm0, %v1045_v33  ;;  %1520 = vst.msk [vmem:[%s2557_s28 + $0xb0] sm:$0xff] %vm1067_vm0, %v1384_v10  ;;  %v1009_v43 = vadd.f32 %v977_v61, %v3117_v14 }
 0x178   : > { %v1354_v16 = vadd.f32 %v1322_v6, %v3118_v19  ;;  %v820_v55 = vadd.f32 %v788_v11, %v2505_v50  ;;  %v1293_v24 = vadd.f32 %v1261_v38, %v2508_v25  ;;  %1083 = vst.msk [vmem:[%s2557_s28 + $0xe8] sm:$0xff] %vm1067_vm0, %v1050_v56  ;;  %1525 = vst.msk [vmem:[%s2557_s28 + $0xf8] sm:$0xff] %vm1067_vm0, %v1389_v63  ;;  %v911_v25 = vpop.permute.xlu0 %910  ;;  %v3120_v11 = vld [vmem:[#allocation49_spill] sm:$0xff] }
 0x179   : > { %v1014_v40 = vadd.f32 %v982_v21, %v818_v13  ;;  %v1359_v35 = vadd.f32 %v1327_v32, %v1291_v5  ;;  %v1047_v4 = vadd.f32 %v2546_v52, %v1009_v43  ;;  %v979_v29 = vmul.f32 %v2357_v54, %v891_v42  ;;  %v3122_v43 = vld [vmem:[#allocation5_spill] sm:$0xff] }
 0x17a   : > { %v1386_v30 = vadd.f32 %v2546_v52, %v1354_v16  ;;  %v1324_v50 = vmul.f32 %v2360_v62, %v891_v42  ;;  %v984_v26 = vmul.f32 %v2357_v54, %v911_v25  ;;  %v1329_v13 = vmul.f32 %v2360_v62, %v911_v25  ;;  %v899_v1 = vpop.permute.xlu1 %898 }
 0x17b   : > { %v1052_v7 = vadd.f32 %v2546_v52, %v1014_v40  ;;  %v1391_v20 = vadd.f32 %v2546_v52, %v1359_v35  ;;  %v822_v5 = vadd.f32 %v790_v15, %v2511_v57  ;;  %v1295_v58 = vadd.f32 %v1263_v18, %v2514_v48  ;;  %1080 = vst.msk [vmem:[%s2557_s28 + $0xc0] sm:$0xff] %vm1067_vm0, %v1047_v4  ;;  %v3121_v18 = vld [vmem:[#allocation4_spill] sm:$0xff] }
 0x17c   : > { %1522 = vst.msk [vmem:[%s2557_s28 + $0xd0] sm:$0xff] %vm1067_vm0, %v1386_v30  ;;  %v1011_v17 = vadd.f32 %v979_v29, %v3119_v12  ;;  %v1356_v38 = vadd.f32 %v1324_v50, %v3120_v11  ;;  %v792_v44 = vmul.f32 %v2010_v36, %v2402_v53  ;;  %v1265_v46 = vmul.f32 %v2013_v28, %v2402_v53  ;;  %v919_v53 = vpop.permute.xlu0 %918 }
 0x17d   : > { %1085 = vst.msk [vmem:[%s2557_s28 + $0x108] sm:$0xff] %vm1067_vm0, %v1052_v7  ;;  %1527 = vst.msk [vmem:[%s2557_s28 + $0x118] sm:$0xff] %vm1067_vm0, %v1391_v20  ;;  %v1016_v48 = vadd.f32 %v984_v26, %v820_v55  ;;  %v1361_v57 = vadd.f32 %v1329_v13, %v1293_v24  ;;  %v981_v61 = vmul.f32 %v2357_v54, %v899_v1  ;;  %v3123_v26 = vld [vmem:[#allocation9_spill] sm:$0xff] }
 0x17e   : > { %v1049_v33 = vadd.f32 %v2546_v52, %v1011_v17  ;;  %v1388_v10 = vadd.f32 %v2546_v52, %v1356_v38  ;;  %v1326_v6 = vmul.f32 %v2360_v62, %v899_v1  ;;  %v986_v63 = vmul.f32 %v2357_v54, %v919_v53  ;;  %v907_v40 = vpop.permute.xlu1 %906 }
 0x17f   : > { %v1054_v22 = vadd.f32 %v2546_v52, %v1016_v48  ;;  %v1393_v56 = vadd.f32 %v2546_v52, %v1361_v57  ;;  %v1331_v21 = vmul.f32 %v2360_v62, %v919_v53  ;;  %v794_v32 = vmul.f32 %v2010_v36, %v2436_v34  ;;  %v3125_v53 = vld [vmem:[#allocation13_spill] sm:$0xff] }
 0x180   : > { %v1267_v15 = vmul.f32 %v2013_v28, %v2436_v34  ;;  %1082 = vst.msk [vmem:[%s2557_s28 + $0xe0] sm:$0xff] %vm1067_vm0, %v1049_v33  ;;  %1524 = vst.msk [vmem:[%s2557_s28 + $0xf0] sm:$0xff] %vm1067_vm0, %v1388_v10  ;;  %v1013_v14 = vadd.f32 %v981_v61, %v3121_v18  ;;  %v1358_v19 = vadd.f32 %v1326_v6, %v3122_v43 }
 0x181   : > { %v824_v16 = vadd.f32 %v792_v44, %v2519_v49  ;;  %v1297_v55 = vadd.f32 %v1265_v46, %v2522_v59  ;;  %1087 = vst.msk [vmem:[%s2557_s28 + $0x128] sm:$0xff] %vm1067_vm0, %v1054_v22  ;;  %1529 = vst.msk [vmem:[%s2557_s28 + $0x138] sm:$0xff] %vm1067_vm0, %v1393_v56  ;;  %v1018_v24 = vadd.f32 %v986_v63, %v822_v5  ;;  %v927_v59 = vpop.permute.xlu0 %926  ;;  %v3124_v5 = vld [vmem:[#allocation10_spill] sm:$0xff]  ;;  %v3126_v56 = vld [vmem:[#allocation51_spill] sm:$0xff] }
 0x182   : > { %v1363_v34 = vadd.f32 %v1331_v21, %v1295_v58  ;;  %v1051_v35 = vadd.f32 %v2546_v52, %v1013_v14  ;;  %v1390_v42 = vadd.f32 %v2546_v52, %v1358_v19  ;;  %v983_v4 = vmul.f32 %v2357_v54, %v907_v40  ;;  %v915_v11 = vpop.permute.xlu1 %914 }
 0x183   : > { %v1328_v49 = vmul.f32 %v2360_v62, %v907_v40  ;;  %v1056_v30 = vadd.f32 %v2546_v52, %v1018_v24  ;;  %v988_v50 = vmul.f32 %v2357_v54, %v927_v59  ;;  %v1333_v25 = vmul.f32 %v2360_v62, %v927_v59 }
 0x184   : > { %v1395_v29 = vadd.f32 %v2546_v52, %v1363_v34  ;;  %v826_v7 = vadd.f32 %v794_v32, %v2534_v27  ;;  %v1299_v20 = vadd.f32 %v1267_v15, %v2537_v51  ;;  %1084 = vst.msk [vmem:[%s2557_s28 + $0x100] sm:$0xff] %vm1067_vm0, %v1051_v35  ;;  %1526 = vst.msk [vmem:[%s2557_s28 + $0x110] sm:$0xff] %vm1067_vm0, %v1390_v42 }
 0x185   : > { %v1015_v13 = vadd.f32 %v983_v4, %v3123_v26  ;;  %v1360_v58 = vadd.f32 %v1328_v49, %v3124_v5  ;;  %v796_v12 = vmul.f32 %v2010_v36, %v2476_v8  ;;  %v1269_v17 = vmul.f32 %v2013_v28, %v2476_v8  ;;  %1089 = vst.msk [vmem:[%s2557_s28 + $0x148] sm:$0xff] %vm1067_vm0, %v1056_v30  ;;  %v935_v8 = vpop.permute.xlu0 %934 }
 0x186   : > { %1531 = vst.msk [vmem:[%s2557_s28 + $0x158] sm:$0xff] %vm1067_vm0, %v1395_v29  ;;  %v1020_v27 = vadd.f32 %v988_v50, %v824_v16  ;;  %v1365_v51 = vadd.f32 %v1333_v25, %v1297_v55  ;;  %v985_v46 = vmul.f32 %v2357_v54, %v915_v11  ;;  %v1330_v48 = vmul.f32 %v2360_v62, %v915_v11  ;;  %v923_v18 = vpop.permute.xlu1 %922 }
 0x187   : > { %v1053_v38 = vadd.f32 %v2546_v52, %v1015_v13  ;;  %v1392_v44 = vadd.f32 %v2546_v52, %v1360_v58  ;;  %v990_v33 = vmul.f32 %v2357_v54, %v935_v8  ;;  %v1335_v10 = vmul.f32 %v2360_v62, %v935_v8  ;;  %v3128_v8 = vld [vmem:[#allocation52_spill] sm:$0xff] }
 0x188   : > { %v1058_v57 = vadd.f32 %v2546_v52, %v1020_v27  ;;  %v1397_v1 = vadd.f32 %v2546_v52, %v1365_v51  ;;  %v798_v61 = vmul.f32 %v2010_v36, %v2516_v0  ;;  %v1271_v6 = vmul.f32 %v2013_v28, %v2516_v0 }
 0x189   : > { %1086 = vst.msk [vmem:[%s2557_s28 + $0x120] sm:$0xff] %vm1067_vm0, %v1053_v38  ;;  %1528 = vst.msk [vmem:[%s2557_s28 + $0x130] sm:$0xff] %vm1067_vm0, %v1392_v44  ;;  %v1017_v22 = vadd.f32 %v985_v46, %v3125_v53  ;;  %v1362_v63 = vadd.f32 %v1330_v48, %v3126_v56  ;;  %v828_v21 = vadd.f32 %v796_v12, %v2570_v2  ;;  %v3127_v46 = vld [vmem:[#allocation16_spill] sm:$0xff] }
 0x18a   : > { %v1301_v32 = vadd.f32 %v1269_v17, %v2573_v31  ;;  %1091 = vst.msk [vmem:[%s2557_s28 + $0x168] sm:$0xff] %vm1067_vm0, %v1058_v57  ;;  %1533 = vst.msk [vmem:[%s2557_s28 + $0x178] sm:$0xff] %vm1067_vm0, %v1397_v1  ;;  %v1022_v15 = vadd.f32 %v990_v33, %v826_v7  ;;  %v1367_v0 = vadd.f32 %v1335_v10, %v1299_v20  ;;  %v943_v31 = vpop.permute.xlu0 %942  ;;  %v931_v30 = vpop.permute.xlu1 %930 }
 0x18b   : > { %v1055_v14 = vadd.f32 %v2546_v52, %v1017_v22  ;;  %v1394_v43 = vadd.f32 %v2546_v52, %v1362_v63  ;;  %v987_v19 = vmul.f32 %v2357_v54, %v923_v18  ;;  %v1332_v2 = vmul.f32 %v2360_v62, %v923_v18 }
 0x18c   : > { %v1060_v16 = vadd.f32 %v2546_v52, %v1022_v15  ;;  %v1399_v55 = vadd.f32 %v2546_v52, %v1367_v0  ;;  %v992_v24 = vmul.f32 %v2357_v54, %v943_v31  ;;  %v1337_v34 = vmul.f32 %v2360_v62, %v943_v31  ;;  %v3130_v15 = vld [vmem:[#allocation24_spill] sm:$0xff]  ;;  %v3131_v31 = vld [vmem:[#allocation25_spill] sm:$0xff] }
 0x18d   : > { %v830_v40 = vadd.f32 %v798_v61, %v2580_v45  ;;  %v1303_v35 = vadd.f32 %v1271_v6, %v2583_v60  ;;  %1088 = vst.msk [vmem:[%s2557_s28 + $0x140] sm:$0xff] %vm1067_vm0, %v1055_v14  ;;  %1530 = vst.msk [vmem:[%s2557_s28 + $0x150] sm:$0xff] %vm1067_vm0, %v1394_v43  ;;  %v1019_v42 = vadd.f32 %v987_v19, %v2352_v47 }
 0x18e   : > { %v1364_v4 = vadd.f32 %v1332_v2, %v2354_v37  ;;  %v800_v49 = vmul.f32 %v2010_v36, %v2552_v39  ;;  %v1273_v59 = vmul.f32 %v2013_v28, %v2552_v39  ;;  %1093 = vst.msk [vmem:[%s2557_s28 + $0x188] sm:$0xff] %vm1067_vm0, %v1060_v16  ;;  %1535 = vst.msk [vmem:[%s2557_s28 + $0x198] sm:$0xff] %vm1067_vm0, %v1399_v55  ;;  %v951_v50 = vpop.permute.xlu0 %950  ;;  %v939_v17 = vpop.permute.xlu1 %938  ;;  %v3132_v55 = vld [vmem:[#allocation18_spill] sm:$0xff] }
 0x18f   : > { %v1024_v45 = vadd.f32 %v992_v24, %v828_v21  ;;  %v1369_v60 = vadd.f32 %v1337_v34, %v1301_v32  ;;  %v1057_v47 = vadd.f32 %v2546_v52, %v1019_v42  ;;  %v989_v36 = vmul.f32 %v2357_v54, %v931_v30  ;;  %v3129_v21 = vld [vmem:[#allocation17_spill] sm:$0xff] }
 0x190   : > { %v1396_v37 = vadd.f32 %v2546_v52, %v1364_v4  ;;  %v1334_v29 = vmul.f32 %v2360_v62, %v931_v30  ;;  %v994_v25 = vmul.f32 %v2357_v54, %v951_v50  ;;  %v1339_v7 = vmul.f32 %v2360_v62, %v951_v50 }
 0x191   : > { %v1062_v28 = vadd.f32 %v2546_v52, %v1024_v45  ;;  %v1401_v39 = vadd.f32 %v2546_v52, %v1369_v60  ;;  %1090 = vst.msk [vmem:[%s2557_s28 + $0x160] sm:$0xff] %vm1067_vm0, %v1057_v47  ;;  %v1021_v20 = vadd.f32 %v989_v36, %v2390_v23  ;;  %v832_v13 = vadd.f32 %v800_v49, %v2590_v9 }
 0x192   : > { %1532 = vst.msk [vmem:[%s2557_s28 + $0x170] sm:$0xff] %vm1067_vm0, %v1396_v37  ;;  %v1366_v26 = vadd.f32 %v1334_v29, %v2392_v41  ;;  %v1305_v5 = vadd.f32 %v1273_v59, %v2593_v3  ;;  %v1026_v58 = vadd.f32 %v994_v25, %v830_v40  ;;  %v1371_v12 = vadd.f32 %v1339_v7, %v1303_v35  ;;  %v959_v51 = vpop.permute.xlu0 %958  ;;  %v947_v10 = vpop.permute.xlu1 %946 }
 0x193   : > { %1095 = vst.msk [vmem:[%s2557_s28 + $0x1a8] sm:$0xff] %vm1067_vm0, %v1062_v28  ;;  %1537 = vst.msk [vmem:[%s2557_s28 + $0x1b8] sm:$0xff] %vm1067_vm0, %v1401_v39  ;;  %v1059_v27 = vadd.f32 %v2546_v52, %v1021_v20  ;;  %v991_v41 = vmul.f32 %v2357_v54, %v939_v17  ;;  %v1336_v9 = vmul.f32 %v2360_v62, %v939_v17 }
 0x194   : > { %v1398_v23 = vadd.f32 %v2546_v52, %v1366_v26  ;;  %v1064_v3 = vadd.f32 %v2546_v52, %v1026_v58  ;;  %v1403_v11 = vadd.f32 %v2546_v52, %v1371_v12  ;;  %v996_v38 = vmul.f32 %v2357_v54, %v959_v51 }
 0x195   : > { %v1341_v44 = vmul.f32 %v2360_v62, %v959_v51  ;;  %1092 = vst.msk [vmem:[%s2557_s28 + $0x180] sm:$0xff] %vm1067_vm0, %v1059_v27  ;;  %v1023_v48 = vadd.f32 %v991_v41, %v3127_v46  ;;  %v1368_v57 = vadd.f32 %v1336_v9, %v3128_v8  ;;  %v993_v53 = vmul.f32 %v2357_v54, %v947_v10 }
 0x196   : > { %1534 = vst.msk [vmem:[%s2557_s28 + $0x190] sm:$0xff] %vm1067_vm0, %v1398_v23  ;;  %1097 = vst.msk [vmem:[%s2557_s28 + $0x1c8] sm:$0xff] %vm1067_vm0, %v1064_v3  ;;  %v1028_v1 = vadd.f32 %v996_v38, %v832_v13  ;;  %v1338_v22 = vmul.f32 %v2360_v62, %v947_v10  ;;  %v955_v18 = vpop.permute.xlu1 %954 }
 0x197   : > { %1539 = vst.msk [vmem:[%s2557_s28 + $0x1d8] sm:$0xff] %vm1067_vm0, %v1403_v11  ;;  %v1373_v33 = vadd.f32 %v1341_v44, %v1305_v5  ;;  %v1061_v61 = vadd.f32 %v2546_v52, %v1023_v48  ;;  %v1400_v6 = vadd.f32 %v2546_v52, %v1368_v57  ;;  %v1025_v32 = vadd.f32 %v993_v53, %v3129_v21 }
 0x198   : > { %v1066_v56 = vadd.f32 %v2546_v52, %v1028_v1  ;;  %v1370_v0 = vadd.f32 %v1338_v22, %v3130_v15  ;;  %v995_v19 = vmul.f32 %v2357_v54, %v955_v18  ;;  %v1340_v2 = vmul.f32 %v2360_v62, %v955_v18 }
 0x199   : > { %v1405_v63 = vadd.f32 %v2546_v52, %v1373_v33  ;;  %1094 = vst.msk [vmem:[%s2557_s28 + $0x1a0] sm:$0xff] %vm1067_vm0, %v1061_v61  ;;  %1536 = vst.msk [vmem:[%s2557_s28 + $0x1b0] sm:$0xff] %vm1067_vm0, %v1400_v6  ;;  %v1063_v14 = vadd.f32 %v2546_v52, %v1025_v32 }
 0x19a   : > { %1099 = vst.msk [vmem:[%s2557_s28 + $0x1e8] sm:$0xff] %vm1067_vm0, %v1066_v56  ;;  %v1402_v43 = vadd.f32 %v2546_v52, %v1370_v0  ;;  %v1027_v16 = vadd.f32 %v995_v19, %v3131_v31  ;;  %v1372_v24 = vadd.f32 %v1340_v2, %v3132_v55 }
 0x19b   : > { %1541 = vst.msk [vmem:[%s2557_s28 + $0x1f8] sm:$0xff] %vm1067_vm0, %v1405_v63  ;;  %1096 = vst.msk [vmem:[%s2557_s28 + $0x1c0] sm:$0xff] %vm1067_vm0, %v1063_v14 }
 0x19c   : > { %1538 = vst.msk [vmem:[%s2557_s28 + $0x1d0] sm:$0xff] %vm1067_vm0, %v1402_v43  ;;  %v1065_v34 = vadd.f32 %v2546_v52, %v1027_v16  ;;  %v1404_v40 = vadd.f32 %v2546_v52, %v1372_v24 }
 0x19e   : > { %1098 = vst.msk [vmem:[%s2557_s28 + $0x1e0] sm:$0xff] %vm1067_vm0, %v1065_v34  ;;  %1540 = vst.msk [vmem:[%s2557_s28 + $0x1f0] sm:$0xff] %vm1067_vm0, %v1404_v40 }
 0x19f PF: > { %s13_s12 = sadd.s32 1, %s1572_s12  }
 0x1a0   : > { %p10_p4 = scmp.ge.s32.totalorder %s13_s12, 4  }
 0x1a2   :  { %12 = sbr.rel (!%p10_p4) target bundleno = 1 (0x1), region = 64 }

</bundles_post_ra>
